<compile_context>
chip_gen: v6e
topology: v6e:2x2x1
jax: 0.10.0
libtpu: 0.0.40
codegen_flags: <defaults>
</compile_context>

<pallas_src>
import functools

import jax
import jax.numpy as jnp
from jax.experimental import pallas as pl
from jax.experimental.pallas import tpu as pltpu


# ----------------------------------------------------------------------------- helpers
def _round_up(v, m):
    return (v + m - 1) // m * m


def _pick_tile(dim, cap, quantum):
    """dim is a multiple of `quantum`; return the largest multiple of `quantum`
    that divides `dim` and is <= cap (so the grid needs no extra over-padding)."""
    if dim <= cap:
        return dim
    best = quantum
    for t in range(quantum, cap + 1, quantum):
        if dim % t == 0:
            best = t
    return best


# ------------------------------------------------------------------- Pallas kernels
def _fused_matmul_kernel(p_ref, w_ref, b_ref, *rest, act, has_residual):
    """K-tiled: acc += P @ W ; on the last K step apply bias (+SiLU) (+residual), store."""
    if has_residual:
        r_ref, o_ref, acc_ref = rest
    else:
        o_ref, acc_ref = rest
        r_ref = None

    @pl.when(pl.program_id(2) == 0)
    def _():
        acc_ref[...] = jnp.zeros_like(acc_ref)

    acc_ref[...] += jnp.dot(p_ref[...], w_ref[...], preferred_element_type=jnp.float32)

    @pl.when(pl.program_id(2) == pl.num_programs(2) - 1)
    def _():
        acc = acc_ref[...] + b_ref[...]            # folded-BN bias, fp32
        if act:
            acc = acc * jax.nn.sigmoid(acc)        # SiLU in fp32 (EUP exp path)
        if has_residual:
            acc = acc + r_ref[...].astype(jnp.float32)   # fused bottleneck shortcut
        o_ref[...] = acc.astype(o_ref.dtype)


def matmul_bias_act(p, w, b, act=True, residual=None, out_dtype=jnp.bfloat16,
                    tm_cap=256, tn_cap=256, tk_cap=512):
    """Fused, tiled (M,K)@(K,C) + bias (+ SiLU) (+ residual) on the MXU.

    bf16 operands, fp32 accumulation in a VMEM scratch, epilogue fused on the last K step.
    """
    M, K = p.shape
    K2, C = w.shape
    assert K == K2

    Mp = _round_up(M, 8)
    Kp = _round_up(K, 128)
    Cp = _round_up(C, 128)
    tm = _pick_tile(Mp, tm_cap, 8)
    tk = _pick_tile(Kp, tk_cap, 128)
    tn = _pick_tile(Cp, tn_cap, 128)

    # bf16 operands (zero-padded K columns contribute 0 to the dot).
    p_pad = jnp.pad(p.astype(jnp.bfloat16), ((0, Mp - M), (0, Kp - K)))
    w_pad = jnp.pad(w.astype(jnp.bfloat16), ((0, Kp - K), (0, Cp - C)))
    b_pad = jnp.pad(b.astype(jnp.float32).reshape(1, C), ((0, 0), (0, Cp - C)))

    inputs = [p_pad, w_pad, b_pad]
    in_specs = [
        pl.BlockSpec((tm, tk), lambda i, j, k: (i, k)),
        pl.BlockSpec((tk, tn), lambda i, j, k: (k, j)),
        pl.BlockSpec((1, tn), lambda i, j, k: (0, j)),
    ]
    has_residual = residual is not None
    if has_residual:
        r_pad = jnp.pad(residual.astype(jnp.bfloat16), ((0, Mp - M), (0, Cp - C)))
        inputs.append(r_pad)
        in_specs.append(pl.BlockSpec((tm, tn), lambda i, j, k: (i, j)))

    grid = (Mp // tm, Cp // tn, Kp // tk)
    out_bytes = jnp.dtype(out_dtype).itemsize
    cost = pl.CostEstimate(
        flops=2 * Mp * Kp * Cp,
        transcendentals=(Mp * Cp) if act else 0,
        bytes_accessed=2 * (Mp * Kp + Kp * Cp) + Mp * Cp * out_bytes + 4 * Cp,
    )

    out = pl.pallas_call(
        functools.partial(_fused_matmul_kernel, act=act, has_residual=has_residual),
        out_shape=jax.ShapeDtypeStruct((Mp, Cp), out_dtype),
        grid=grid,
        in_specs=in_specs,
        out_specs=pl.BlockSpec((tm, tn), lambda i, j, k: (i, j)),
        scratch_shapes=[pltpu.VMEM((tm, tn), jnp.float32)],
        compiler_params=pltpu.CompilerParams(
            dimension_semantics=("parallel", "parallel", "arbitrary"),
            vmem_limit_bytes=32 * 1024 * 1024,
        ),
        cost_estimate=cost,
    )(*inputs)

    if Mp == M and Cp == C:
        return out
    return out[:M, :C]


# ------------------------------------------------------------------------- JAX glue
def im2col(x, kh, kw, stride, pad):
    """x: (N,H,W,C) -> patches (N*Ho*Wo, kh*kw*C); channel fastest within a tap."""
    N, H, W, C = x.shape
    xp = jnp.pad(x, ((0, 0), (pad, pad), (pad, pad), (0, 0)))
    Ho = (H + 2 * pad - kh) // stride + 1
    Wo = (W + 2 * pad - kw) // stride + 1
    cols = []
    for dy in range(kh):
        for dx in range(kw):
            cols.append(xp[:, dy:dy + stride * Ho:stride, dx:dx + stride * Wo:stride, :])
    patches = jnp.concatenate(cols, axis=-1)  # (N, Ho, Wo, kh*kw*C)
    return patches.reshape(N * Ho * Wo, kh * kw * C), (N, Ho, Wo)


def conv_block(x, params, stride, pad, act=True, residual=None, out_dtype=jnp.bfloat16):
    """YOLOv5 'Conv' block = Conv2d + (BN folded into bias) + SiLU, fused in Pallas."""
    w, b = params  # w: (kh, kw, Cin, Cout) fp32 master weights
    kh, kw, cin, cout = w.shape
    if kh == 1 and kw == 1 and stride == 1 and pad == 0:
        # 1x1 conv: skip im2col entirely -> direct (N*H*W, Cin) matmul.
        N, H, W, _ = x.shape
        p = x.reshape(N * H * W, cin)
        Ho, Wo = H, W
    else:
        # TODO(synk): fuse im2col into the Pallas pipeline (spatially-blocked input
        # index_map / manual DMA) so the kh*kw-amplified patch matrix never hits HBM.
        p, (N, Ho, Wo) = im2col(x, kh, kw, stride, pad)
    r = residual.reshape(N * Ho * Wo, cout) if residual is not None else None
    out = matmul_bias_act(p, w.reshape(kh * kw * cin, cout), b,
                          act=act, residual=r, out_dtype=out_dtype)
    return out.reshape(N, Ho, Wo, cout)


def init_conv(key, kh, kw, cin, cout):
    k1, k2 = jax.random.split(key)
    fan_in = kh * kw * cin
    w = jax.random.normal(k1, (kh, kw, cin, cout), jnp.float32) / jnp.sqrt(float(fan_in))
    b = 0.01 * jax.random.normal(k2, (cout,), jnp.float32)
    return w, b


# ------------------------------------------------------------------------ the model
class YoloV5LPallas:
    """Width/depth-scaled YOLOv5-L: stem -> down -> C3(n=1) -> down -> Detect(1 scale)."""

    def __init__(self, num_classes, anchors, key, width=(32, 64, 128)):
        self.nc = num_classes
        self.anchors = jnp.asarray(anchors, jnp.float32)  # (na, 2); only used at decode
        self.na = self.anchors.shape[0]
        self.no = num_classes + 5
        c1, c2, c3 = width
        keys = jax.random.split(key, 9)
        self.stem = init_conv(keys[0], 6, 6, 3, c1)              # P1/2 (6x6 s2 p2, v6 stem)
        self.down1 = init_conv(keys[1], 3, 3, c1, c2)            # P2/4
        self.c3_cv1 = init_conv(keys[2], 1, 1, c2, c2 // 2)      # C3 block
        self.c3_cv2 = init_conv(keys[3], 1, 1, c2, c2 // 2)
        self.c3_b1 = init_conv(keys[4], 1, 1, c2 // 2, c2 // 2)
        self.c3_b2 = init_conv(keys[5], 3, 3, c2 // 2, c2 // 2)
        self.c3_cv3 = init_conv(keys[6], 1, 1, c2, c2)
        self.down2 = init_conv(keys[7], 3, 3, c2, c3)            # P3/8
        self.head = init_conv(keys[8], 1, 1, c3, self.na * self.no)  # Detect conv (no act)

    def __call__(self, x):
        # x: (N, 3, H, W) NCHW like PyTorch -> NHWC bf16 activations for the kernels.
        x = jnp.transpose(x, (0, 2, 3, 1)).astype(jnp.bfloat16)
        x = conv_block(x, self.stem, stride=2, pad=2)
        x = conv_block(x, self.down1, stride=2, pad=1)
        # C3 (n=1, shortcut=True)
        y1 = conv_block(x, self.c3_cv1, 1, 0)
        y2 = conv_block(x, self.c3_cv2, 1, 0)
        b = conv_block(y1, self.c3_b1, 1, 0)
        # bottleneck shortcut fused into the conv epilogue (no standalone add kernel)
        y1 = conv_block(b, self.c3_b2, 1, 1, residual=y1)
        # TODO(synk): write y1/y2 into adjacent column slabs of one output buffer to
        # delete this concat instead of an extra HBM pass.
        y = jnp.concatenate([y1, y2], axis=-1)
        x = conv_block(y, self.c3_cv3, 1, 0)
        x = conv_block(x, self.down2, stride=2, pad=1)
        # Detect head, training-mode output: raw conv reshaped to (bs, na, ny, nx, no)
        p = conv_block(x, self.head, 1, 0, act=False, out_dtype=jnp.float32)
        N, Ho, Wo, _ = p.shape
        p = p.reshape(N, Ho, Wo, self.na, self.no)
        p = jnp.transpose(p, (0, 3, 1, 2, 4))
        return p


# --------------------------------------------------------------------------- driver
if __name__ == "__main__":
    key = jax.random.PRNGKey(0)
    k_params, k_x = jax.random.split(key)

    num_classes = 4
    anchors = [[10.0, 13.0], [16.0, 30.0], [33.0, 23.0]]  # one scale, 3 anchors
    model = YoloV5LPallas(num_classes, anchors, k_params)

    x = jax.random.normal(k_x, (2, 3, 16, 16), jnp.float32)  # small NCHW input
    out = jax.jit(model.__call__)(x)
    out = jax.block_until_ready(out)

    assert out.shape == (2, 3, 2, 2, num_classes + 5), out.shape
    assert jnp.all(jnp.isfinite(out))
    print("KERNEL_OK")
</pallas_src>

<mosaic_0001>
module attributes {stable_mosaic.version = 11 : i64} {
  func.func @_fused_matmul_kernel(%arg0: i32, %arg1: i32, %arg2: i32, %arg3: memref<128x128xbf16, #tpu.memory_space<vmem>>, %arg4: memref<128x128xbf16, #tpu.memory_space<vmem>>, %arg5: memref<1x128xf32, #tpu.memory_space<vmem>>, %arg6: memref<128x128xbf16, #tpu.memory_space<vmem>>, %arg7: memref<128x128xf32, #tpu.memory_space<vmem>>) attributes {dimension_semantics = [#tpu.dimension_semantics<parallel>, #tpu.dimension_semantics<parallel>, #tpu.dimension_semantics<arbitrary>], iteration_bounds = array<i64: 1, 1, 1>, scalar_prefetch = 0 : i64, scratch_operands = 1 : i64, tpu.core_type = #tpu.core_type<tc>, window_params = [{transform_indices = @transform_0, window_bounds = array<i64: 128, 128>}, {transform_indices = @transform_1, window_bounds = array<i64: 128, 128>}, {transform_indices = @transform_2, window_bounds = array<i64: 1, 128>}, {transform_indices = @transform_3, window_bounds = array<i64: 128, 128>}]} {
    %c0_i32 = arith.constant 0 : i32
    %0 = arith.cmpi eq, %arg2, %c0_i32 : i32
    %1 = arith.extui %0 : i1 to i32
    %c0_i32_0 = arith.constant 0 : i32
    %2 = arith.cmpi ne, %1, %c0_i32_0 : i32
    scf.if %2 {
      %cst_10 = arith.constant 0.000000e+00 : f32
      %12 = vector.broadcast %cst_10 : f32 to vector<128x128xf32>
      %c0_11 = arith.constant 0 : index
      %c0_12 = arith.constant 0 : index
      %13 = vector.load %arg7[%c0_11, %c0_12] : memref<128x128xf32, #tpu.memory_space<vmem>>, vector<128x128xf32>
      tpu.vector_store %arg7[%c0_11, %c0_12], %12 {strides = array<i32>} : memref<128x128xf32, #tpu.memory_space<vmem>>, vector<128x128xf32>,
    } else {
    }
    %c0 = arith.constant 0 : index
    %c0_1 = arith.constant 0 : index
    %3 = vector.load %arg7[%c0, %c0_1] : memref<128x128xf32, #tpu.memory_space<vmem>>, vector<128x128xf32>
    %c0_2 = arith.constant 0 : index
    %c0_3 = arith.constant 0 : index
    %4 = vector.load %arg3[%c0_2, %c0_3] : memref<128x128xbf16, #tpu.memory_space<vmem>>, vector<128x128xbf16>
    %c0_4 = arith.constant 0 : index
    %c0_5 = arith.constant 0 : index
    %5 = vector.load %arg4[%c0_4, %c0_5] : memref<128x128xbf16, #tpu.memory_space<vmem>>, vector<128x128xbf16>
    %cst = arith.constant dense<0.000000e+00> : vector<128x128xf32>
    %6 = tpu.matmul %4, %5, %cst {dimension_numbers = #tpu.dot_dimension_numbers<[1], [0], [0], [1], [0, 0, 1, 1], [], []>} : vector<128x128xbf16>, vector<128x128xbf16>, vector<128x128xf32> -> vector<128x128xf32>
    %7 = arith.addf %3, %6 : vector<128x128xf32>
    %c0_6 = arith.constant 0 : index
    %c0_7 = arith.constant 0 : index
    %8 = vector.load %arg7[%c0_6, %c0_7] : memref<128x128xf32, #tpu.memory_space<vmem>>, vector<128x128xf32>
    tpu.vector_store %arg7[%c0_6, %c0_7], %7 {strides = array<i32>} : memref<128x128xf32, #tpu.memory_space<vmem>>, vector<128x128xf32>,
    %c0_i32_8 = arith.constant 0 : i32
    %9 = arith.cmpi eq, %arg2, %c0_i32_8 : i32
    %10 = arith.extui %9 : i1 to i32
    %c0_i32_9 = arith.constant 0 : i32
    %11 = arith.cmpi ne, %10, %c0_i32_9 : i32
    scf.if %11 {
      %c0_10 = arith.constant 0 : index
      %c0_11 = arith.constant 0 : index
      %12 = vector.load %arg7[%c0_10, %c0_11] : memref<128x128xf32, #tpu.memory_space<vmem>>, vector<128x128xf32>
      %c0_12 = arith.constant 0 : index
      %c0_13 = arith.constant 0 : index
      %13 = vector.load %arg5[%c0_12, %c0_13] : memref<1x128xf32, #tpu.memory_space<vmem>>, vector<1x128xf32>
      %14 = vector.broadcast %13 : vector<1x128xf32> to vector<128x128xf32>
      %15 = arith.addf %12, %14 : vector<128x128xf32>
      %16 = arith.negf %15 : vector<128x128xf32>
      %17 = math.exp %16 : vector<128x128xf32>
      %cst_14 = arith.constant 1.000000e+00 : f32
      %18 = vector.broadcast %cst_14 : f32 to vector<128x128xf32>
      %19 = arith.addf %18, %17 : vector<128x128xf32>
      %20 = arith.divf %18, %19 : vector<128x128xf32>
      %21 = arith.mulf %15, %20 : vector<128x128xf32>
      %22 = arith.truncf %21 : vector<128x128xf32> to vector<128x128xbf16>
      %c0_15 = arith.constant 0 : index
      %c0_16 = arith.constant 0 : index
      %23 = vector.load %arg6[%c0_15, %c0_16] : memref<128x128xbf16, #tpu.memory_space<vmem>>, vector<128x128xbf16>
      tpu.vector_store %arg6[%c0_15, %c0_16], %22 {strides = array<i32>} : memref<128x128xbf16, #tpu.memory_space<vmem>>, vector<128x128xbf16>,
    } else {
    }
    return
  }
  func.func @transform_0(%arg0: i32, %arg1: i32, %arg2: i32) -> (i32, i32) {
    %c0_i32 = arith.constant 0 : i32
    return %arg0, %arg2 : i32, i32
  }
  func.func @transform_1(%arg0: i32, %arg1: i32, %arg2: i32) -> (i32, i32) {
    %c0_i32 = arith.constant 0 : i32
    return %arg2, %arg1 : i32, i32
  }
  func.func @transform_2(%arg0: i32, %arg1: i32, %arg2: i32) -> (i32, i32) {
    %c0_i32 = arith.constant 0 : i32
    %c0_i32_0 = arith.constant 0 : i32
    return %c0_i32, %arg1 : i32, i32
  }
  func.func @transform_3(%arg0: i32, %arg1: i32, %arg2: i32) -> (i32, i32) {
    %c0_i32 = arith.constant 0 : i32
    return %arg0, %arg1 : i32, i32
  }
}

module attributes {stable_mosaic.version = 11 : i64} {
  func.func @_fused_matmul_kernel(%arg0: i32, %arg1: i32, %arg2: i32, %arg3: memref<32x384xbf16, #tpu.memory_space<vmem>>, %arg4: memref<384x128xbf16, #tpu.memory_space<vmem>>, %arg5: memref<1x128xf32, #tpu.memory_space<vmem>>, %arg6: memref<32x128xbf16, #tpu.memory_space<vmem>>, %arg7: memref<32x128xf32, #tpu.memory_space<vmem>>) attributes {dimension_semantics = [#tpu.dimension_semantics<parallel>, #tpu.dimension_semantics<parallel>, #tpu.dimension_semantics<arbitrary>], iteration_bounds = array<i64: 1, 1, 1>, scalar_prefetch = 0 : i64, scratch_operands = 1 : i64, tpu.core_type = #tpu.core_type<tc>, window_params = [{transform_indices = @transform_0, window_bounds = array<i64: 32, 384>}, {transform_indices = @transform_1, window_bounds = array<i64: 384, 128>}, {transform_indices = @transform_2, window_bounds = array<i64: 1, 128>}, {transform_indices = @transform_3, window_bounds = array<i64: 32, 128>}]} {
    %c0_i32 = arith.constant 0 : i32
    %0 = arith.cmpi eq, %arg2, %c0_i32 : i32
    %1 = arith.extui %0 : i1 to i32
    %c0_i32_0 = arith.constant 0 : i32
    %2 = arith.cmpi ne, %1, %c0_i32_0 : i32
    scf.if %2 {
      %cst_10 = arith.constant 0.000000e+00 : f32
      %12 = vector.broadcast %cst_10 : f32 to vector<32x128xf32>
      %c0_11 = arith.constant 0 : index
      %c0_12 = arith.constant 0 : index
      %13 = vector.load %arg7[%c0_11, %c0_12] : memref<32x128xf32, #tpu.memory_space<vmem>>, vector<32x128xf32>
      tpu.vector_store %arg7[%c0_11, %c0_12], %12 {strides = array<i32>} : memref<32x128xf32, #tpu.memory_space<vmem>>, vector<32x128xf32>,
    } else {
    }
    %c0 = arith.constant 0 : index
    %c0_1 = arith.constant 0 : index
    %3 = vector.load %arg7[%c0, %c0_1] : memref<32x128xf32, #tpu.memory_space<vmem>>, vector<32x128xf32>
    %c0_2 = arith.constant 0 : index
    %c0_3 = arith.constant 0 : index
    %4 = vector.load %arg3[%c0_2, %c0_3] : memref<32x384xbf16, #tpu.memory_space<vmem>>, vector<32x384xbf16>
    %c0_4 = arith.constant 0 : index
    %c0_5 = arith.constant 0 : index
    %5 = vector.load %arg4[%c0_4, %c0_5] : memref<384x128xbf16, #tpu.memory_space<vmem>>, vector<384x128xbf16>
    %cst = arith.constant dense<0.000000e+00> : vector<32x128xf32>
    %6 = tpu.matmul %4, %5, %cst {dimension_numbers = #tpu.dot_dimension_numbers<[1], [0], [0], [1], [0, 0, 1, 1], [], []>} : vector<32x384xbf16>, vector<384x128xbf16>, vector<32x128xf32> -> vector<32x128xf32>
    %7 = arith.addf %3, %6 : vector<32x128xf32>
    %c0_6 = arith.constant 0 : index
    %c0_7 = arith.constant 0 : index
    %8 = vector.load %arg7[%c0_6, %c0_7] : memref<32x128xf32, #tpu.memory_space<vmem>>, vector<32x128xf32>
    tpu.vector_store %arg7[%c0_6, %c0_7], %7 {strides = array<i32>} : memref<32x128xf32, #tpu.memory_space<vmem>>, vector<32x128xf32>,
    %c0_i32_8 = arith.constant 0 : i32
    %9 = arith.cmpi eq, %arg2, %c0_i32_8 : i32
    %10 = arith.extui %9 : i1 to i32
    %c0_i32_9 = arith.constant 0 : i32
    %11 = arith.cmpi ne, %10, %c0_i32_9 : i32
    scf.if %11 {
      %c0_10 = arith.constant 0 : index
      %c0_11 = arith.constant 0 : index
      %12 = vector.load %arg7[%c0_10, %c0_11] : memref<32x128xf32, #tpu.memory_space<vmem>>, vector<32x128xf32>
      %c0_12 = arith.constant 0 : index
      %c0_13 = arith.constant 0 : index
      %13 = vector.load %arg5[%c0_12, %c0_13] : memref<1x128xf32, #tpu.memory_space<vmem>>, vector<1x128xf32>
      %14 = vector.broadcast %13 : vector<1x128xf32> to vector<32x128xf32>
      %15 = arith.addf %12, %14 : vector<32x128xf32>
      %16 = arith.negf %15 : vector<32x128xf32>
      %17 = math.exp %16 : vector<32x128xf32>
      %cst_14 = arith.constant 1.000000e+00 : f32
      %18 = vector.broadcast %cst_14 : f32 to vector<32x128xf32>
      %19 = arith.addf %18, %17 : vector<32x128xf32>
      %20 = arith.divf %18, %19 : vector<32x128xf32>
      %21 = arith.mulf %15, %20 : vector<32x128xf32>
      %22 = arith.truncf %21 : vector<32x128xf32> to vector<32x128xbf16>
      %c0_15 = arith.constant 0 : index
      %c0_16 = arith.constant 0 : index
      %23 = vector.load %arg6[%c0_15, %c0_16] : memref<32x128xbf16, #tpu.memory_space<vmem>>, vector<32x128xbf16>
      tpu.vector_store %arg6[%c0_15, %c0_16], %22 {strides = array<i32>} : memref<32x128xbf16, #tpu.memory_space<vmem>>, vector<32x128xbf16>,
    } else {
    }
    return
  }
  func.func @transform_0(%arg0: i32, %arg1: i32, %arg2: i32) -> (i32, i32) {
    %c0_i32 = arith.constant 0 : i32
    return %arg0, %arg2 : i32, i32
  }
  func.func @transform_1(%arg0: i32, %arg1: i32, %arg2: i32) -> (i32, i32) {
    %c0_i32 = arith.constant 0 : i32
    return %arg2, %arg1 : i32, i32
  }
  func.func @transform_2(%arg0: i32, %arg1: i32, %arg2: i32) -> (i32, i32) {
    %c0_i32 = arith.constant 0 : i32
    %c0_i32_0 = arith.constant 0 : i32
    return %c0_i32, %arg1 : i32, i32
  }
  func.func @transform_3(%arg0: i32, %arg1: i32, %arg2: i32) -> (i32, i32) {
    %c0_i32 = arith.constant 0 : i32
    return %arg0, %arg1 : i32, i32
  }
}

module attributes {stable_mosaic.version = 11 : i64} {
  func.func @_fused_matmul_kernel(%arg0: i32, %arg1: i32, %arg2: i32, %arg3: memref<32x128xbf16, #tpu.memory_space<vmem>>, %arg4: memref<128x128xbf16, #tpu.memory_space<vmem>>, %arg5: memref<1x128xf32, #tpu.memory_space<vmem>>, %arg6: memref<32x128xbf16, #tpu.memory_space<vmem>>, %arg7: memref<32x128xf32, #tpu.memory_space<vmem>>) attributes {dimension_semantics = [#tpu.dimension_semantics<parallel>, #tpu.dimension_semantics<parallel>, #tpu.dimension_semantics<arbitrary>], iteration_bounds = array<i64: 1, 1, 1>, scalar_prefetch = 0 : i64, scratch_operands = 1 : i64, tpu.core_type = #tpu.core_type<tc>, window_params = [{transform_indices = @transform_0, window_bounds = array<i64: 32, 128>}, {transform_indices = @transform_1, window_bounds = array<i64: 128, 128>}, {transform_indices = @transform_2, window_bounds = array<i64: 1, 128>}, {transform_indices = @transform_3, window_bounds = array<i64: 32, 128>}]} {
    %c0_i32 = arith.constant 0 : i32
    %0 = arith.cmpi eq, %arg2, %c0_i32 : i32
    %1 = arith.extui %0 : i1 to i32
    %c0_i32_0 = arith.constant 0 : i32
    %2 = arith.cmpi ne, %1, %c0_i32_0 : i32
    scf.if %2 {
      %cst_10 = arith.constant 0.000000e+00 : f32
      %12 = vector.broadcast %cst_10 : f32 to vector<32x128xf32>
      %c0_11 = arith.constant 0 : index
      %c0_12 = arith.constant 0 : index
      %13 = vector.load %arg7[%c0_11, %c0_12] : memref<32x128xf32, #tpu.memory_space<vmem>>, vector<32x128xf32>
      tpu.vector_store %arg7[%c0_11, %c0_12], %12 {strides = array<i32>} : memref<32x128xf32, #tpu.memory_space<vmem>>, vector<32x128xf32>,
    } else {
    }
    %c0 = arith.constant 0 : index
    %c0_1 = arith.constant 0 : index
    %3 = vector.load %arg7[%c0, %c0_1] : memref<32x128xf32, #tpu.memory_space<vmem>>, vector<32x128xf32>
    %c0_2 = arith.constant 0 : index
    %c0_3 = arith.constant 0 : index
    %4 = vector.load %arg3[%c0_2, %c0_3] : memref<32x128xbf16, #tpu.memory_space<vmem>>, vector<32x128xbf16>
    %c0_4 = arith.constant 0 : index
    %c0_5 = arith.constant 0 : index
    %5 = vector.load %arg4[%c0_4, %c0_5] : memref<128x128xbf16, #tpu.memory_space<vmem>>, vector<128x128xbf16>
    %cst = arith.constant dense<0.000000e+00> : vector<32x128xf32>
    %6 = tpu.matmul %4, %5, %cst {dimension_numbers = #tpu.dot_dimension_numbers<[1], [0], [0], [1], [0, 0, 1, 1], [], []>} : vector<32x128xbf16>, vector<128x128xbf16>, vector<32x128xf32> -> vector<32x128xf32>
    %7 = arith.addf %3, %6 : vector<32x128xf32>
    %c0_6 = arith.constant 0 : index
    %c0_7 = arith.constant 0 : index
    %8 = vector.load %arg7[%c0_6, %c0_7] : memref<32x128xf32, #tpu.memory_space<vmem>>, vector<32x128xf32>
    tpu.vector_store %arg7[%c0_6, %c0_7], %7 {strides = array<i32>} : memref<32x128xf32, #tpu.memory_space<vmem>>, vector<32x128xf32>,
    %c0_i32_8 = arith.constant 0 : i32
    %9 = arith.cmpi eq, %arg2, %c0_i32_8 : i32
    %10 = arith.extui %9 : i1 to i32
    %c0_i32_9 = arith.constant 0 : i32
    %11 = arith.cmpi ne, %10, %c0_i32_9 : i32
    scf.if %11 {
      %c0_10 = arith.constant 0 : index
      %c0_11 = arith.constant 0 : index
      %12 = vector.load %arg7[%c0_10, %c0_11] : memref<32x128xf32, #tpu.memory_space<vmem>>, vector<32x128xf32>
      %c0_12 = arith.constant 0 : index
      %c0_13 = arith.constant 0 : index
      %13 = vector.load %arg5[%c0_12, %c0_13] : memref<1x128xf32, #tpu.memory_space<vmem>>, vector<1x128xf32>
      %14 = vector.broadcast %13 : vector<1x128xf32> to vector<32x128xf32>
      %15 = arith.addf %12, %14 : vector<32x128xf32>
      %16 = arith.negf %15 : vector<32x128xf32>
      %17 = math.exp %16 : vector<32x128xf32>
      %cst_14 = arith.constant 1.000000e+00 : f32
      %18 = vector.broadcast %cst_14 : f32 to vector<32x128xf32>
      %19 = arith.addf %18, %17 : vector<32x128xf32>
      %20 = arith.divf %18, %19 : vector<32x128xf32>
      %21 = arith.mulf %15, %20 : vector<32x128xf32>
      %22 = arith.truncf %21 : vector<32x128xf32> to vector<32x128xbf16>
      %c0_15 = arith.constant 0 : index
      %c0_16 = arith.constant 0 : index
      %23 = vector.load %arg6[%c0_15, %c0_16] : memref<32x128xbf16, #tpu.memory_space<vmem>>, vector<32x128xbf16>
      tpu.vector_store %arg6[%c0_15, %c0_16], %22 {strides = array<i32>} : memref<32x128xbf16, #tpu.memory_space<vmem>>, vector<32x128xbf16>,
    } else {
    }
    return
  }
  func.func @transform_0(%arg0: i32, %arg1: i32, %arg2: i32) -> (i32, i32) {
    %c0_i32 = arith.constant 0 : i32
    return %arg0, %arg2 : i32, i32
  }
  func.func @transform_1(%arg0: i32, %arg1: i32, %arg2: i32) -> (i32, i32) {
    %c0_i32 = arith.constant 0 : i32
    return %arg2, %arg1 : i32, i32
  }
  func.func @transform_2(%arg0: i32, %arg1: i32, %arg2: i32) -> (i32, i32) {
    %c0_i32 = arith.constant 0 : i32
    %c0_i32_0 = arith.constant 0 : i32
    return %c0_i32, %arg1 : i32, i32
  }
  func.func @transform_3(%arg0: i32, %arg1: i32, %arg2: i32) -> (i32, i32) {
    %c0_i32 = arith.constant 0 : i32
    return %arg0, %arg1 : i32, i32
  }
}

module attributes {stable_mosaic.version = 11 : i64} {
  func.func @_fused_matmul_kernel(%arg0: i32, %arg1: i32, %arg2: i32, %arg3: memref<32x384xbf16, #tpu.memory_space<vmem>>, %arg4: memref<384x128xbf16, #tpu.memory_space<vmem>>, %arg5: memref<1x128xf32, #tpu.memory_space<vmem>>, %arg6: memref<32x128xbf16, #tpu.memory_space<vmem>>, %arg7: memref<32x128xbf16, #tpu.memory_space<vmem>>, %arg8: memref<32x128xf32, #tpu.memory_space<vmem>>) attributes {dimension_semantics = [#tpu.dimension_semantics<parallel>, #tpu.dimension_semantics<parallel>, #tpu.dimension_semantics<arbitrary>], iteration_bounds = array<i64: 1, 1, 1>, scalar_prefetch = 0 : i64, scratch_operands = 1 : i64, tpu.core_type = #tpu.core_type<tc>, window_params = [{transform_indices = @transform_0, window_bounds = array<i64: 32, 384>}, {transform_indices = @transform_1, window_bounds = array<i64: 384, 128>}, {transform_indices = @transform_2, window_bounds = array<i64: 1, 128>}, {transform_indices = @transform_3, window_bounds = array<i64: 32, 128>}, {transform_indices = @transform_4, window_bounds = array<i64: 32, 128>}]} {
    %c0_i32 = arith.constant 0 : i32
    %0 = arith.cmpi eq, %arg2, %c0_i32 : i32
    %1 = arith.extui %0 : i1 to i32
    %c0_i32_0 = arith.constant 0 : i32
    %2 = arith.cmpi ne, %1, %c0_i32_0 : i32
    scf.if %2 {
      %cst_10 = arith.constant 0.000000e+00 : f32
      %12 = vector.broadcast %cst_10 : f32 to vector<32x128xf32>
      %c0_11 = arith.constant 0 : index
      %c0_12 = arith.constant 0 : index
      %13 = vector.load %arg8[%c0_11, %c0_12] : memref<32x128xf32, #tpu.memory_space<vmem>>, vector<32x128xf32>
      tpu.vector_store %arg8[%c0_11, %c0_12], %12 {strides = array<i32>} : memref<32x128xf32, #tpu.memory_space<vmem>>, vector<32x128xf32>,
    } else {
    }
    %c0 = arith.constant 0 : index
    %c0_1 = arith.constant 0 : index
    %3 = vector.load %arg8[%c0, %c0_1] : memref<32x128xf32, #tpu.memory_space<vmem>>, vector<32x128xf32>
    %c0_2 = arith.constant 0 : index
    %c0_3 = arith.constant 0 : index
    %4 = vector.load %arg3[%c0_2, %c0_3] : memref<32x384xbf16, #tpu.memory_space<vmem>>, vector<32x384xbf16>
    %c0_4 = arith.constant 0 : index
    %c0_5 = arith.constant 0 : index
    %5 = vector.load %arg4[%c0_4, %c0_5] : memref<384x128xbf16, #tpu.memory_space<vmem>>, vector<384x128xbf16>
    %cst = arith.constant dense<0.000000e+00> : vector<32x128xf32>
    %6 = tpu.matmul %4, %5, %cst {dimension_numbers = #tpu.dot_dimension_numbers<[1], [0], [0], [1], [0, 0, 1, 1], [], []>} : vector<32x384xbf16>, vector<384x128xbf16>, vector<32x128xf32> -> vector<32x128xf32>
    %7 = arith.addf %3, %6 : vector<32x128xf32>
    %c0_6 = arith.constant 0 : index
    %c0_7 = arith.constant 0 : index
    %8 = vector.load %arg8[%c0_6, %c0_7] : memref<32x128xf32, #tpu.memory_space<vmem>>, vector<32x128xf32>
    tpu.vector_store %arg8[%c0_6, %c0_7], %7 {strides = array<i32>} : memref<32x128xf32, #tpu.memory_space<vmem>>, vector<32x128xf32>,
    %c0_i32_8 = arith.constant 0 : i32
    %9 = arith.cmpi eq, %arg2, %c0_i32_8 : i32
    %10 = arith.extui %9 : i1 to i32
    %c0_i32_9 = arith.constant 0 : i32
    %11 = arith.cmpi ne, %10, %c0_i32_9 : i32
    scf.if %11 {
      %c0_10 = arith.constant 0 : index
      %c0_11 = arith.constant 0 : index
      %12 = vector.load %arg8[%c0_10, %c0_11] : memref<32x128xf32, #tpu.memory_space<vmem>>, vector<32x128xf32>
      %c0_12 = arith.constant 0 : index
      %c0_13 = arith.constant 0 : index
      %13 = vector.load %arg5[%c0_12, %c0_13] : memref<1x128xf32, #tpu.memory_space<vmem>>, vector<1x128xf32>
      %14 = vector.broadcast %13 : vector<1x128xf32> to vector<32x128xf32>
      %15 = arith.addf %12, %14 : vector<32x128xf32>
      %16 = arith.negf %15 : vector<32x128xf32>
      %17 = math.exp %16 : vector<32x128xf32>
      %cst_14 = arith.constant 1.000000e+00 : f32
      %18 = vector.broadcast %cst_14 : f32 to vector<32x128xf32>
      %19 = arith.addf %18, %17 : vector<32x128xf32>
      %20 = arith.divf %18, %19 : vector<32x128xf32>
      %21 = arith.mulf %15, %20 : vector<32x128xf32>
      %c0_15 = arith.constant 0 : index
      %c0_16 = arith.constant 0 : index
      %22 = vector.load %arg6[%c0_15, %c0_16] : memref<32x128xbf16, #tpu.memory_space<vmem>>, vector<32x128xbf16>
      %23 = arith.extf %22 : vector<32x128xbf16> to vector<32x128xf32>
      %24 = arith.addf %21, %23 : vector<32x128xf32>
      %25 = arith.truncf %24 : vector<32x128xf32> to vector<32x128xbf16>
      %c0_17 = arith.constant 0 : index
      %c0_18 = arith.constant 0 : index
      %26 = vector.load %arg7[%c0_17, %c0_18] : memref<32x128xbf16, #tpu.memory_space<vmem>>, vector<32x128xbf16>
      tpu.vector_store %arg7[%c0_17, %c0_18], %25 {strides = array<i32>} : memref<32x128xbf16, #tpu.memory_space<vmem>>, vector<32x128xbf16>,
    } else {
    }
    return
  }
  func.func @transform_0(%arg0: i32, %arg1: i32, %arg2: i32) -> (i32, i32) {
    %c0_i32 = arith.constant 0 : i32
    return %arg0, %arg2 : i32, i32
  }
  func.func @transform_1(%arg0: i32, %arg1: i32, %arg2: i32) -> (i32, i32) {
    %c0_i32 = arith.constant 0 : i32
    return %arg2, %arg1 : i32, i32
  }
  func.func @transform_2(%arg0: i32, %arg1: i32, %arg2: i32) -> (i32, i32) {
    %c0_i32 = arith.constant 0 : i32
    %c0_i32_0 = arith.constant 0 : i32
    return %c0_i32, %arg1 : i32, i32
  }
  func.func @transform_3(%arg0: i32, %arg1: i32, %arg2: i32) -> (i32, i32) {
    %c0_i32 = arith.constant 0 : i32
    return %arg0, %arg1 : i32, i32
  }
  func.func @transform_4(%arg0: i32, %arg1: i32, %arg2: i32) -> (i32, i32) {
    %c0_i32 = arith.constant 0 : i32
    return %arg0, %arg1 : i32, i32
  }
}

module attributes {stable_mosaic.version = 11 : i64} {
  func.func @_fused_matmul_kernel(%arg0: i32, %arg1: i32, %arg2: i32, %arg3: memref<8x128xbf16, #tpu.memory_space<vmem>>, %arg4: memref<128x128xbf16, #tpu.memory_space<vmem>>, %arg5: memref<1x128xf32, #tpu.memory_space<vmem>>, %arg6: memref<8x128xbf16, #tpu.memory_space<vmem>>, %arg7: memref<8x128xf32, #tpu.memory_space<vmem>>) attributes {dimension_semantics = [#tpu.dimension_semantics<parallel>, #tpu.dimension_semantics<parallel>, #tpu.dimension_semantics<arbitrary>], iteration_bounds = array<i64: 1, 1, 5>, scalar_prefetch = 0 : i64, scratch_operands = 1 : i64, tpu.core_type = #tpu.core_type<tc>, window_params = [{transform_indices = @transform_0, window_bounds = array<i64: 8, 128>}, {transform_indices = @transform_1, window_bounds = array<i64: 128, 128>}, {transform_indices = @transform_2, window_bounds = array<i64: 1, 128>}, {transform_indices = @transform_3, window_bounds = array<i64: 8, 128>}]} {
    %c0_i32 = arith.constant 0 : i32
    %0 = arith.cmpi eq, %arg2, %c0_i32 : i32
    %1 = arith.extui %0 : i1 to i32
    %c0_i32_0 = arith.constant 0 : i32
    %2 = arith.cmpi ne, %1, %c0_i32_0 : i32
    scf.if %2 {
      %cst_9 = arith.constant 0.000000e+00 : f32
      %12 = vector.broadcast %cst_9 : f32 to vector<8x128xf32>
      %c0_10 = arith.constant 0 : index
      %c0_11 = arith.constant 0 : index
      %13 = vector.load %arg7[%c0_10, %c0_11] : memref<8x128xf32, #tpu.memory_space<vmem>>, vector<8x128xf32>
      tpu.vector_store %arg7[%c0_10, %c0_11], %12 {strides = array<i32>} : memref<8x128xf32, #tpu.memory_space<vmem>>, vector<8x128xf32>,
    } else {
    }
    %c0 = arith.constant 0 : index
    %c0_1 = arith.constant 0 : index
    %3 = vector.load %arg7[%c0, %c0_1] : memref<8x128xf32, #tpu.memory_space<vmem>>, vector<8x128xf32>
    %c0_2 = arith.constant 0 : index
    %c0_3 = arith.constant 0 : index
    %4 = vector.load %arg3[%c0_2, %c0_3] : memref<8x128xbf16, #tpu.memory_space<vmem>>, vector<8x128xbf16>
    %c0_4 = arith.constant 0 : index
    %c0_5 = arith.constant 0 : index
    %5 = vector.load %arg4[%c0_4, %c0_5] : memref<128x128xbf16, #tpu.memory_space<vmem>>, vector<128x128xbf16>
    %cst = arith.constant dense<0.000000e+00> : vector<8x128xf32>
    %6 = tpu.matmul %4, %5, %cst {dimension_numbers = #tpu.dot_dimension_numbers<[1], [0], [0], [1], [0, 0, 1, 1], [], []>} : vector<8x128xbf16>, vector<128x128xbf16>, vector<8x128xf32> -> vector<8x128xf32>
    %7 = arith.addf %3, %6 : vector<8x128xf32>
    %c0_6 = arith.constant 0 : index
    %c0_7 = arith.constant 0 : index
    %8 = vector.load %arg7[%c0_6, %c0_7] : memref<8x128xf32, #tpu.memory_space<vmem>>, vector<8x128xf32>
    tpu.vector_store %arg7[%c0_6, %c0_7], %7 {strides = array<i32>} : memref<8x128xf32, #tpu.memory_space<vmem>>, vector<8x128xf32>,
    %c4_i32 = arith.constant 4 : i32
    %9 = arith.cmpi eq, %arg2, %c4_i32 : i32
    %10 = arith.extui %9 : i1 to i32
    %c0_i32_8 = arith.constant 0 : i32
    %11 = arith.cmpi ne, %10, %c0_i32_8 : i32
    scf.if %11 {
      %c0_9 = arith.constant 0 : index
      %c0_10 = arith.constant 0 : index
      %12 = vector.load %arg7[%c0_9, %c0_10] : memref<8x128xf32, #tpu.memory_space<vmem>>, vector<8x128xf32>
      %c0_11 = arith.constant 0 : index
      %c0_12 = arith.constant 0 : index
      %13 = vector.load %arg5[%c0_11, %c0_12] : memref<1x128xf32, #tpu.memory_space<vmem>>, vector<1x128xf32>
      %14 = vector.broadcast %13 : vector<1x128xf32> to vector<8x128xf32>
      %15 = arith.addf %12, %14 : vector<8x128xf32>
      %16 = arith.negf %15 : vector<8x128xf32>
      %17 = math.exp %16 : vector<8x128xf32>
      %cst_13 = arith.constant 1.000000e+00 : f32
      %18 = vector.broadcast %cst_13 : f32 to vector<8x128xf32>
      %19 = arith.addf %18, %17 : vector<8x128xf32>
      %20 = arith.divf %18, %19 : vector<8x128xf32>
      %21 = arith.mulf %15, %20 : vector<8x128xf32>
      %22 = arith.truncf %21 : vector<8x128xf32> to vector<8x128xbf16>
      %c0_14 = arith.constant 0 : index
      %c0_15 = arith.constant 0 : index
      %23 = vector.load %arg6[%c0_14, %c0_15] : memref<8x128xbf16, #tpu.memory_space<vmem>>, vector<8x128xbf16>
      tpu.vector_store %arg6[%c0_14, %c0_15], %22 {strides = array<i32>} : memref<8x128xbf16, #tpu.memory_space<vmem>>, vector<8x128xbf16>,
    } else {
    }
    return
  }
  func.func @transform_0(%arg0: i32, %arg1: i32, %arg2: i32) -> (i32, i32) {
    %c0_i32 = arith.constant 0 : i32
    return %arg0, %arg2 : i32, i32
  }
  func.func @transform_1(%arg0: i32, %arg1: i32, %arg2: i32) -> (i32, i32) {
    %c0_i32 = arith.constant 0 : i32
    return %arg2, %arg1 : i32, i32
  }
  func.func @transform_2(%arg0: i32, %arg1: i32, %arg2: i32) -> (i32, i32) {
    %c0_i32 = arith.constant 0 : i32
    %c0_i32_0 = arith.constant 0 : i32
    return %c0_i32, %arg1 : i32, i32
  }
  func.func @transform_3(%arg0: i32, %arg1: i32, %arg2: i32) -> (i32, i32) {
    %c0_i32 = arith.constant 0 : i32
    return %arg0, %arg1 : i32, i32
  }
}

module attributes {stable_mosaic.version = 11 : i64} {
  func.func @_fused_matmul_kernel(%arg0: i32, %arg1: i32, %arg2: i32, %arg3: memref<8x128xbf16, #tpu.memory_space<vmem>>, %arg4: memref<128x128xbf16, #tpu.memory_space<vmem>>, %arg5: memref<1x128xf32, #tpu.memory_space<vmem>>, %arg6: memref<8x128xf32, #tpu.memory_space<vmem>>, %arg7: memref<8x128xf32, #tpu.memory_space<vmem>>) attributes {dimension_semantics = [#tpu.dimension_semantics<parallel>, #tpu.dimension_semantics<parallel>, #tpu.dimension_semantics<arbitrary>], iteration_bounds = array<i64: 1, 1, 1>, scalar_prefetch = 0 : i64, scratch_operands = 1 : i64, tpu.core_type = #tpu.core_type<tc>, window_params = [{transform_indices = @transform_0, window_bounds = array<i64: 8, 128>}, {transform_indices = @transform_1, window_bounds = array<i64: 128, 128>}, {transform_indices = @transform_2, window_bounds = array<i64: 1, 128>}, {transform_indices = @transform_3, window_bounds = array<i64: 8, 128>}]} {
    %c0_i32 = arith.constant 0 : i32
    %0 = arith.cmpi eq, %arg2, %c0_i32 : i32
    %1 = arith.extui %0 : i1 to i32
    %c0_i32_0 = arith.constant 0 : i32
    %2 = arith.cmpi ne, %1, %c0_i32_0 : i32
    scf.if %2 {
      %cst_10 = arith.constant 0.000000e+00 : f32
      %12 = vector.broadcast %cst_10 : f32 to vector<8x128xf32>
      %c0_11 = arith.constant 0 : index
      %c0_12 = arith.constant 0 : index
      %13 = vector.load %arg7[%c0_11, %c0_12] : memref<8x128xf32, #tpu.memory_space<vmem>>, vector<8x128xf32>
      tpu.vector_store %arg7[%c0_11, %c0_12], %12 {strides = array<i32>} : memref<8x128xf32, #tpu.memory_space<vmem>>, vector<8x128xf32>,
    } else {
    }
    %c0 = arith.constant 0 : index
    %c0_1 = arith.constant 0 : index
    %3 = vector.load %arg7[%c0, %c0_1] : memref<8x128xf32, #tpu.memory_space<vmem>>, vector<8x128xf32>
    %c0_2 = arith.constant 0 : index
    %c0_3 = arith.constant 0 : index
    %4 = vector.load %arg3[%c0_2, %c0_3] : memref<8x128xbf16, #tpu.memory_space<vmem>>, vector<8x128xbf16>
    %c0_4 = arith.constant 0 : index
    %c0_5 = arith.constant 0 : index
    %5 = vector.load %arg4[%c0_4, %c0_5] : memref<128x128xbf16, #tpu.memory_space<vmem>>, vector<128x128xbf16>
    %cst = arith.constant dense<0.000000e+00> : vector<8x128xf32>
    %6 = tpu.matmul %4, %5, %cst {dimension_numbers = #tpu.dot_dimension_numbers<[1], [0], [0], [1], [0, 0, 1, 1], [], []>} : vector<8x128xbf16>, vector<128x128xbf16>, vector<8x128xf32> -> vector<8x128xf32>
    %7 = arith.addf %3, %6 : vector<8x128xf32>
    %c0_6 = arith.constant 0 : index
    %c0_7 = arith.constant 0 : index
    %8 = vector.load %arg7[%c0_6, %c0_7] : memref<8x128xf32, #tpu.memory_space<vmem>>, vector<8x128xf32>
    tpu.vector_store %arg7[%c0_6, %c0_7], %7 {strides = array<i32>} : memref<8x128xf32, #tpu.memory_space<vmem>>, vector<8x128xf32>,
    %c0_i32_8 = arith.constant 0 : i32
    %9 = arith.cmpi eq, %arg2, %c0_i32_8 : i32
    %10 = arith.extui %9 : i1 to i32
    %c0_i32_9 = arith.constant 0 : i32
    %11 = arith.cmpi ne, %10, %c0_i32_9 : i32
    scf.if %11 {
      %c0_10 = arith.constant 0 : index
      %c0_11 = arith.constant 0 : index
      %12 = vector.load %arg7[%c0_10, %c0_11] : memref<8x128xf32, #tpu.memory_space<vmem>>, vector<8x128xf32>
      %c0_12 = arith.constant 0 : index
      %c0_13 = arith.constant 0 : index
      %13 = vector.load %arg5[%c0_12, %c0_13] : memref<1x128xf32, #tpu.memory_space<vmem>>, vector<1x128xf32>
      %14 = vector.broadcast %13 : vector<1x128xf32> to vector<8x128xf32>
      %15 = arith.addf %12, %14 : vector<8x128xf32>
      %c0_14 = arith.constant 0 : index
      %c0_15 = arith.constant 0 : index
      %16 = vector.load %arg6[%c0_14, %c0_15] : memref<8x128xf32, #tpu.memory_space<vmem>>, vector<8x128xf32>
      tpu.vector_store %arg6[%c0_14, %c0_15], %15 {strides = array<i32>} : memref<8x128xf32, #tpu.memory_space<vmem>>, vector<8x128xf32>,
    } else {
    }
    return
  }
  func.func @transform_0(%arg0: i32, %arg1: i32, %arg2: i32) -> (i32, i32) {
    %c0_i32 = arith.constant 0 : i32
    return %arg0, %arg2 : i32, i32
  }
  func.func @transform_1(%arg0: i32, %arg1: i32, %arg2: i32) -> (i32, i32) {
    %c0_i32 = arith.constant 0 : i32
    return %arg2, %arg1 : i32, i32
  }
  func.func @transform_2(%arg0: i32, %arg1: i32, %arg2: i32) -> (i32, i32) {
    %c0_i32 = arith.constant 0 : i32
    %c0_i32_0 = arith.constant 0 : i32
    return %c0_i32, %arg1 : i32, i32
  }
  func.func @transform_3(%arg0: i32, %arg1: i32, %arg2: i32) -> (i32, i32) {
    %c0_i32 = arith.constant 0 : i32
    return %arg0, %arg1 : i32, i32
  }
}

</mosaic_0001>

<bundles_post_ra>
// kernel: a_call__.9
= control target key start
LH: loop header
LB: loop body
LE: loop exit
PB: predicated region body
PF: predicated region fallthrough
CT: control target
= control target key end

     0   :  { %s961_s1 = inlined_call_operand.vmem [shape: bf16[128,128], index: 1, kind: input, shape index: {}]   ;;  %s962_s0 = inlined_call_operand.vmem [shape: bf16[128,128], index: 0, kind: input, shape index: {}]   ;;  %s963_s2 = inlined_call_operand.vmem [shape: f32[1,128], index: 2, kind: input, shape index: {}]   ;;  %s964_s3 = inlined_call_operand.vmem [shape: bf16[128,128], index: 3, kind: output, shape index: {}]  }
   0x1   :  { %v722_v0 = vld [vmem:[%s961_s1 + $0x38] sm:$0xff]   ;;  %v723_v1 = vld [vmem:[%s961_s1 + $0x30] sm:$0xff]   ;;  %v724_v2 = vld [vmem:[%s961_s1 + $0x28] sm:$0xff]  }
   0x2   :  { %674 = vmatprep.subr.bf16.mxu0 %v722_v0  ;;  %706 = vmatprep.subr.bf16.mxu1 %v722_v0  ;;  %v725_v3 = vld [vmem:[%s961_s1 + $0x20] sm:$0xff]   ;;  %v726_v6 = vld [vmem:[%s961_s1 + $0x18] sm:$0xff]   ;;  %v727_v7 = vld [vmem:[%s961_s1 + $0x10] sm:$0xff]  }
   0x3   :  { %675 = vmatpush3.bf16.msra.mxu0 %v722_v0  ;;  %714 = vmatpush3.bf16.msra.mxu1 %v722_v0  ;;  %v730_v4 = vld [vmem:[%s962_s0] sm:$0xff]   ;;  %v728_v8 = vld [vmem:[%s961_s1 + $0x8] sm:$0xff]   ;;  %v734_v12 = vld [vmem:[%s962_s0 + $0x10] sm:$0xff]  }
   0x4   :  { %676 = vmatprep.subr.bf16.mxu0 %v723_v1  ;;  %707 = vmatprep.subr.bf16.mxu1 %v723_v1  ;;  %v731_v5 = vld [vmem:[%s962_s0 + $0x20] sm:$0xff]   ;;  %v732_v10 = vld [vmem:[%s962_s0 + $0x8] sm:$0xff]   ;;  %v735_v13 = vld [vmem:[%s962_s0 + $0x30] sm:$0xff]  }
   0x5   :  { %690 = vmatprep.mubr.bf16.mxu0 %v730_v4  ;;  %698 = vmatprep.mubr.bf16.mxu1 %v731_v5  ;;  %v729_v9 = vld [vmem:[%s961_s1] sm:$0xff]   ;;  %v733_v11 = vld [vmem:[%s962_s0 + $0x28] sm:$0xff]   ;;  %v736_v14 = vld [vmem:[%s962_s0 + $0x18] sm:$0xff]  }
   0x6   :  { %v737_v15 = vld [vmem:[%s962_s0 + $0x38] sm:$0xff]   ;;  %v562_v16 = vld [vmem:[%s963_s2] ss:$0 sm:$0xff] }
   0x7   :  { %677 = vmatpush3.bf16.msra.mxu0 %v723_v1  ;;  %715 = vmatpush3.bf16.msra.mxu1 %v723_v1 }
   0x8   :  { %678 = vmatprep.subr.bf16.mxu0 %v724_v2  ;;  %708 = vmatprep.subr.bf16.mxu1 %v724_v2 }
   0xb   :  { %679 = vmatpush3.bf16.msra.mxu0 %v724_v2  ;;  %716 = vmatpush3.bf16.msra.mxu1 %v724_v2 }
   0xc   :  { %680 = vmatprep.subr.bf16.mxu0 %v725_v3  ;;  %709 = vmatprep.subr.bf16.mxu1 %v725_v3 }
   0xf   :  { %681 = vmatpush3.bf16.msra.mxu0 %v725_v3  ;;  %717 = vmatpush3.bf16.msra.mxu1 %v725_v3 }
  0x10   :  { %682 = vmatprep.subr.bf16.mxu0 %v726_v6  ;;  %710 = vmatprep.subr.bf16.mxu1 %v726_v6 }
  0x13   :  { %683 = vmatpush3.bf16.msra.mxu0 %v726_v6  ;;  %718 = vmatpush3.bf16.msra.mxu1 %v726_v6 }
  0x14   :  { %684 = vmatprep.subr.bf16.mxu0 %v727_v7  ;;  %711 = vmatprep.subr.bf16.mxu1 %v727_v7 }
  0x17   :  { %685 = vmatpush3.bf16.msra.mxu0 %v727_v7  ;;  %719 = vmatpush3.bf16.msra.mxu1 %v727_v7 }
  0x18   :  { %686 = vmatprep.subr.bf16.mxu0 %v728_v8  ;;  %712 = vmatprep.subr.bf16.mxu1 %v728_v8 }
  0x1b   :  { %687 = vmatpush3.bf16.msra.mxu0 %v728_v8  ;;  %720 = vmatpush3.bf16.msra.mxu1 %v728_v8 }
  0x1c   :  { %688 = vmatprep.subr.bf16.mxu0 %v729_v9  ;;  %713 = vmatprep.subr.bf16.mxu1 %v729_v9 }
  0x1f   :  { %689 = vmatpush3.bf16.msra.mxu0 %v729_v9  ;;  %721 = vmatpush3.bf16.msra.mxu1 %v729_v9 }
  0x22   :  { %691 = vmatmul.mubr.bf16.vlgmr.msra.gmra.mxu0 %v732_v10  ;;  %699 = vmatmul.mubr.bf16.vlgmr.msra.gmra.mxu1 %v733_v11 }
  0x23   :  { %694 = vmatprep.mubr.bf16.mxu0 %v734_v12  ;;  %702 = vmatprep.mubr.bf16.mxu1 %v735_v13 }
  0x2a   :  { %695 = vmatmul.mubr.bf16.gmra.mxu0 %v736_v14  ;;  %703 = vmatmul.mubr.bf16.gmra.mxu1 %v737_v15 }
  0xe2   :  { %v692_v17 = vpop.f32.mrf.mxu0  ;;  %v700_v18 = vpop.f32.mrf.mxu1 }
  0xe3   :  { %v873_v19 = vadd.f32 %v692_v17, %v562_v16  ;;  %v875_v20 = vadd.f32 %v700_v18, %v562_v16 }
  0xe4   :  { %v213_v21 = vpop.f32.mrf.mxu0  ;;  %v245_v22 = vpop.f32.mrf.mxu1 }
  0xe5   :  { %v565_v23 = vmul.f32 -1.442695, %v873_v19  ;;  %v573_v24 = vmul.f32 -1.442695, %v875_v20  ;;  %v879_v25 = vadd.f32 %v562_v16, %v213_v21  ;;  %v881_v26 = vadd.f32 %v562_v16, %v245_v22 }
  0xe6   :  { %v693_v27 = vpop.f32.mrf.mxu0  ;;  %v701_v28 = vpop.f32.mrf.mxu1 }
  0xe7   :  { %738 = vpow2.f32 %v565_v23  ;;  %v563_v29 = vmul.f32 -1.442695, %v879_v25  ;;  %v571_v30 = vmul.f32 -1.442695, %v881_v26  ;;  %v885_v31 = vadd.f32 %v693_v27, %v562_v16 }
  0xe8   :  { %740 = vpow2.f32 %v573_v24  ;;  %v887_v32 = vadd.f32 %v701_v28, %v562_v16  ;;  %v216_v33 = vpop.f32.mrf.mxu0  ;;  %v248_v34 = vpop.f32.mrf.mxu1 }
  0xe9   :  { %742 = vpow2.f32 %v563_v29  ;;  %v566_v35 = vmul.f32 -1.442695, %v885_v31  ;;  %v890_v36 = vadd.f32 %v562_v16, %v216_v33  ;;  %v892_v37 = vadd.f32 %v562_v16, %v248_v34 }
  0xea   :  { %744 = vpow2.f32 %v571_v30  ;;  %v574_v38 = vmul.f32 -1.442695, %v887_v32  ;;  %v696_v39 = vpop.f32.mrf.mxu0  ;;  %v704_v40 = vpop.f32.mrf.mxu1 }
  0xeb   :  { %746 = vpow2.f32 %v566_v35  ;;  %v564_v41 = vmul.f32 -1.442695, %v890_v36  ;;  %v572_v42 = vmul.f32 -1.442695, %v892_v37  ;;  %v897_v43 = vadd.f32 %v696_v39, %v562_v16 }
  0xec   :  { %748 = vpow2.f32 %v574_v38  ;;  %v899_v44 = vadd.f32 %v704_v40, %v562_v16  ;;  %v229_v45 = vpop.f32.mrf.mxu0  ;;  %v261_v46 = vpop.f32.mrf.mxu1 }
  0xed   :  { %750 = vpow2.f32 %v564_v41  ;;  %v569_v47 = vmul.f32 -1.442695, %v897_v43  ;;  %v902_v48 = vadd.f32 %v562_v16, %v229_v45  ;;  %v904_v49 = vadd.f32 %v562_v16, %v261_v46 }
  0xee   :  { %752 = vpow2.f32 %v572_v42  ;;  %v577_v50 = vmul.f32 -1.442695, %v899_v44  ;;  %v697_v51 = vpop.f32.mrf.mxu0  ;;  %v705_v52 = vpop.f32.mrf.mxu1 }
  0xef   :  { %754 = vpow2.f32 %v569_v47  ;;  %v567_v53 = vmul.f32 -1.442695, %v902_v48  ;;  %v575_v54 = vmul.f32 -1.442695, %v904_v49  ;;  %v909_v55 = vadd.f32 %v697_v51, %v562_v16 }
  0xf0   :  { %756 = vpow2.f32 %v577_v50  ;;  %v911_v56 = vadd.f32 %v705_v52, %v562_v16  ;;  %v232_v57 = vpop.f32.mrf.mxu0  ;;  %v264_v58 = vpop.f32.mrf.mxu1 }
  0xf1   :  { %758 = vpow2.f32 %v567_v53  ;;  %v570_v59 = vmul.f32 -1.442695, %v909_v55  ;;  %v914_v60 = vadd.f32 %v562_v16, %v232_v57  ;;  %v916_v61 = vadd.f32 %v562_v16, %v264_v58 }
  0xf2   :  { %760 = vpow2.f32 %v575_v54  ;;  %v578_v62 = vmul.f32 -1.442695, %v911_v56 }
  0xf3   :  { %762 = vpow2.f32 %v570_v59  ;;  %v568_v63 = vmul.f32 -1.442695, %v914_v60  ;;  %v576_v0 = vmul.f32 -1.442695, %v916_v61 }
  0xf4   :  { %v739_v1 = vpop.eup %738  ;;  %764 = vpow2.f32 %v578_v62 }
  0xf5   :  { %v741_v2 = vpop.eup %740  ;;  %v400_v3 = vadd.f32 1.0, %v739_v1  ;;  %766 = vpow2.f32 %v568_v63 }
  0xf6   :  { %v743_v4 = vpop.eup %742  ;;  %v408_v5 = vadd.f32 1.0, %v741_v2  ;;  %768 = vpow2.f32 %v576_v0 }
  0xf7   :  { %v745_v6 = vpop.eup %744  ;;  %770 = vrcp.f32 %v400_v3  ;;  %v398_v7 = vadd.f32 1.0, %v743_v4 }
  0xf8   :  { %v747_v8 = vpop.eup %746  ;;  %772 = vrcp.f32 %v408_v5  ;;  %v406_v9 = vadd.f32 1.0, %v745_v6 }
  0xf9   :  { %v749_v10 = vpop.eup %748  ;;  %774 = vrcp.f32 %v398_v7  ;;  %v401_v11 = vadd.f32 1.0, %v747_v8 }
  0xfa   :  { %v751_v12 = vpop.eup %750  ;;  %776 = vrcp.f32 %v406_v9  ;;  %v409_v13 = vadd.f32 1.0, %v749_v10 }
  0xfb   :  { %v753_v14 = vpop.eup %752  ;;  %778 = vrcp.f32 %v401_v11  ;;  %v399_v15 = vadd.f32 1.0, %v751_v12 }
  0xfc   :  { %v755_v16 = vpop.eup %754  ;;  %780 = vrcp.f32 %v409_v13  ;;  %v407_v17 = vadd.f32 1.0, %v753_v14 }
  0xfd   :  { %v757_v18 = vpop.eup %756  ;;  %782 = vrcp.f32 %v399_v15  ;;  %v404_v21 = vadd.f32 1.0, %v755_v16 }
  0xfe   :  { %v759_v22 = vpop.eup %758  ;;  %784 = vrcp.f32 %v407_v17  ;;  %v412_v23 = vadd.f32 1.0, %v757_v18 }
  0xff   :  { %v761_v24 = vpop.eup %760  ;;  %786 = vrcp.f32 %v404_v21  ;;  %v402_v27 = vadd.f32 1.0, %v759_v22 }
 0x100   :  { %v763_v28 = vpop.eup %762  ;;  %788 = vrcp.f32 %v412_v23  ;;  %v410_v29 = vadd.f32 1.0, %v761_v24 }
 0x101   :  { %v765_v30 = vpop.eup %764  ;;  %790 = vrcp.f32 %v402_v27  ;;  %v405_v33 = vadd.f32 1.0, %v763_v28 }
 0x102   :  { %v767_v34 = vpop.eup %766  ;;  %792 = vrcp.f32 %v410_v29  ;;  %v413_v35 = vadd.f32 1.0, %v765_v30 }
 0x103   :  { %v769_v38 = vpop.eup %768  ;;  %794 = vrcp.f32 %v405_v33  ;;  %v403_v39 = vadd.f32 1.0, %v767_v34 }
 0x104   :  { %v771_v40 = vpop.eup %770  ;;  %796 = vrcp.f32 %v413_v35  ;;  %v411_v41 = vadd.f32 1.0, %v769_v38 }
 0x105   :  { %v773_v42 = vpop.eup %772  ;;  %798 = vrcp.f32 %v403_v39  ;;  %v448_v51 = vmul.f32 %v771_v40, %v873_v19 }
 0x106   :  { %v775_v45 = vpop.eup %774  ;;  %800 = vrcp.f32 %v411_v41  ;;  %v456_v54 = vmul.f32 %v773_v42, %v875_v20 }
 0x107   :  { %v777_v46 = vpop.eup %776  ;;  %v446_v59 = vmul.f32 %v775_v45, %v879_v25 }
 0x108   :  { %v779_v47 = vpop.eup %778  ;;  %v454_v1 = vmul.f32 %v777_v46, %v881_v26 }
 0x109   :  { %v781_v50 = vpop.eup %780  ;;  %v449_v52 = vmul.f32 %v779_v47, %v885_v31 }
 0x10a   :  { %v783_v53 = vpop.eup %782  ;;  %v457_v57 = vmul.f32 %v781_v50, %v887_v32 }
 0x10b   :  { %v785_v58 = vpop.eup %784  ;;  %v619_v62 = vpack.c.bf16 %v449_v52, %v448_v51  ;;  %v447_v63 = vmul.f32 %v783_v53, %v890_v36 }
 0x10c   :  { %v787_v0 = vpop.eup %786  ;;  %v639_v2 = vpack.c.bf16 %v457_v57, %v456_v54  ;;  %v455_v3 = vmul.f32 %v785_v58, %v892_v37 }
 0x10d   :  { %v789_v19 = vpop.eup %788  ;;  %651 = vst [vmem:[%s964_s3 + $0x8] sm:$0xff] %v619_v62   ;;  %v614_v20 = vpack.c.bf16 %v447_v63, %v446_v59  ;;  %v452_v37 = vmul.f32 %v787_v0, %v897_v43 }
 0x10e   :  { %v791_v31 = vpop.eup %790  ;;  %655 = vst [vmem:[%s964_s3 + $0x28] sm:$0xff] %v639_v2   ;;  %v634_v25 = vpack.c.bf16 %v455_v3, %v454_v1  ;;  %v460_v6 = vmul.f32 %v789_v19, %v899_v44 }
 0x10f   :  { %v793_v32 = vpop.eup %792  ;;  %615 = vst [vmem:[%s964_s3] sm:$0xff] %v614_v20   ;;  %v450_v9 = vmul.f32 %v791_v31, %v902_v48 }
 0x110   :  { %v795_v26 = vpop.eup %794  ;;  %654 = vst [vmem:[%s964_s3 + $0x20] sm:$0xff] %v634_v25   ;;  %v458_v12 = vmul.f32 %v793_v32, %v904_v49 }
 0x111   :  { %v797_v36 = vpop.eup %796  ;;  %v453_v4 = vmul.f32 %v795_v26, %v909_v55 }
 0x112   :  { %v799_v5 = vpop.eup %798  ;;  %v461_v7 = vmul.f32 %v797_v36, %v911_v56 }
 0x113   :  { %v801_v8 = vpop.eup %800  ;;  %v629_v10 = vpack.c.bf16 %v453_v4, %v452_v37  ;;  %v451_v11 = vmul.f32 %v799_v5, %v914_v60 }
 0x114   :  { %v649_v13 = vpack.c.bf16 %v461_v7, %v460_v6  ;;  %v459_v14 = vmul.f32 %v801_v8, %v916_v61 }
 0x115   :  { %653 = vst [vmem:[%s964_s3 + $0x18] sm:$0xff] %v629_v10   ;;  %v624_v43 = vpack.c.bf16 %v451_v11, %v450_v9 }
 0x116   :  { %657 = vst [vmem:[%s964_s3 + $0x38] sm:$0xff] %v649_v13   ;;  %v644_v44 = vpack.c.bf16 %v459_v14, %v458_v12 }
 0x117   :  { %652 = vst [vmem:[%s964_s3 + $0x10] sm:$0xff] %v624_v43  }
 0x118   :  { %656 = vst [vmem:[%s964_s3 + $0x30] sm:$0xff] %v644_v44  }

// kernel: a_call__.12
= control target key start
LH: loop header
LB: loop body
LE: loop exit
PB: predicated region body
PF: predicated region fallthrough
CT: control target
= control target key end

     0   :  { %s383_s1 = inlined_call_operand.vmem [shape: bf16[128,128], index: 1, kind: input, shape index: {}]   ;;  %s384_s0 = inlined_call_operand.vmem [shape: bf16[32,128], index: 0, kind: input, shape index: {}]   ;;  %s385_s2 = inlined_call_operand.vmem [shape: f32[1,128], index: 2, kind: input, shape index: {}]   ;;  %s386_s3 = inlined_call_operand.vmem [shape: bf16[32,128], index: 3, kind: output, shape index: {}]  }
   0x1   :  { %v298_v0 = vld [vmem:[%s383_s1 + $0x38] sm:$0xff]   ;;  %v299_v1 = vld [vmem:[%s383_s1 + $0x30] sm:$0xff]   ;;  %v300_v2 = vld [vmem:[%s383_s1 + $0x28] sm:$0xff]  }
   0x2   :  { %278 = vmatprep.subr.bf16.mxu0 %v298_v0  ;;  %v301_v3 = vld [vmem:[%s383_s1 + $0x20] sm:$0xff]   ;;  %v302_v5 = vld [vmem:[%s383_s1 + $0x18] sm:$0xff]   ;;  %v303_v6 = vld [vmem:[%s383_s1 + $0x10] sm:$0xff]  }
   0x3   :  { %279 = vmatpush3.bf16.msra.mxu0 %v298_v0  ;;  %v306_v4 = vld [vmem:[%s384_s0] sm:$0xff]   ;;  %v304_v7 = vld [vmem:[%s383_s1 + $0x8] sm:$0xff]  }
   0x4   :  { %280 = vmatprep.subr.bf16.mxu0 %v299_v1  ;;  %294 = vmatprep.mubr.bf16.mxu0 %v306_v4  ;;  %v305_v8 = vld [vmem:[%s383_s1] sm:$0xff]   ;;  %v307_v9 = vld [vmem:[%s384_s0 + $0x8] sm:$0xff]  }
   0x5   :  { %v244_v10 = vld [vmem:[%s385_s2] ss:$0 sm:$0xff] }
   0x7   :  { %281 = vmatpush3.bf16.msra.mxu0 %v299_v1 }
   0x8   :  { %282 = vmatprep.subr.bf16.mxu0 %v300_v2 }
   0xb   :  { %283 = vmatpush3.bf16.msra.mxu0 %v300_v2 }
   0xc   :  { %284 = vmatprep.subr.bf16.mxu0 %v301_v3 }
   0xf   :  { %285 = vmatpush3.bf16.msra.mxu0 %v301_v3 }
  0x10   :  { %286 = vmatprep.subr.bf16.mxu0 %v302_v5 }
  0x13   :  { %287 = vmatpush3.bf16.msra.mxu0 %v302_v5 }
  0x14   :  { %288 = vmatprep.subr.bf16.mxu0 %v303_v6 }
  0x17   :  { %289 = vmatpush3.bf16.msra.mxu0 %v303_v6 }
  0x18   :  { %290 = vmatprep.subr.bf16.mxu0 %v304_v7 }
  0x1b   :  { %291 = vmatpush3.bf16.msra.mxu0 %v304_v7 }
  0x1c   :  { %292 = vmatprep.subr.bf16.mxu0 %v305_v8 }
  0x1f   :  { %293 = vmatpush3.bf16.msra.mxu0 %v305_v8 }
  0x22   :  { %295 = vmatmul.mubr.bf16.vlgmr.msra.gmra.mxu0 %v307_v9 }
  0xe2   :  { %v296_v11 = vpop.f32.mrf.mxu0 }
  0xe3   :  { %v180_v12 = vadd.f32 %v296_v11, %v244_v10 }
  0xe4   :  { %v141_v13 = vpop.f32.mrf.mxu0 }
  0xe5   :  { %v247_v14 = vmul.f32 -1.442695, %v180_v12  ;;  %v178_v15 = vadd.f32 %v244_v10, %v141_v13 }
  0xe6   :  { %v297_v16 = vpop.f32.mrf.mxu0 }
  0xe7   :  { %308 = vpow2.f32 %v247_v14  ;;  %v245_v17 = vmul.f32 -1.442695, %v178_v15  ;;  %v181_v18 = vadd.f32 %v297_v16, %v244_v10 }
  0xe8   :  { %v144_v19 = vpop.f32.mrf.mxu0 }
  0xe9   :  { %310 = vpow2.f32 %v245_v17  ;;  %v248_v20 = vmul.f32 -1.442695, %v181_v18  ;;  %v179_v21 = vadd.f32 %v244_v10, %v144_v19 }
  0xeb   :  { %312 = vpow2.f32 %v248_v20  ;;  %v246_v22 = vmul.f32 -1.442695, %v179_v21 }
  0xed   :  { %314 = vpow2.f32 %v246_v22 }
  0xf4   :  { %v309_v23 = vpop.eup %308 }
  0xf5   :  { %v196_v24 = vadd.f32 1.0, %v309_v23 }
  0xf6   :  { %v311_v25 = vpop.eup %310 }
  0xf7   :  { %v194_v26 = vadd.f32 1.0, %v311_v25  ;;  %316 = vrcp.f32 %v196_v24 }
  0xf8   :  { %v313_v27 = vpop.eup %312 }
  0xf9   :  { %v197_v28 = vadd.f32 1.0, %v313_v27  ;;  %318 = vrcp.f32 %v194_v26 }
  0xfa   :  { %v315_v29 = vpop.eup %314 }
  0xfb   :  { %320 = vrcp.f32 %v197_v28  ;;  %v195_v30 = vadd.f32 1.0, %v315_v29 }
  0xfd   :  { %322 = vrcp.f32 %v195_v30 }
 0x104   :  { %v317_v31 = vpop.eup %316 }
 0x105   :  { %v208_v34 = vmul.f32 %v317_v31, %v180_v12 }
 0x106   :  { %v319_v32 = vpop.eup %318 }
 0x107   :  { %v206_v37 = vmul.f32 %v319_v32, %v178_v15 }
 0x108   :  { %v321_v33 = vpop.eup %320 }
 0x109   :  { %v209_v35 = vmul.f32 %v321_v33, %v181_v18 }
 0x10a   :  { %v323_v36 = vpop.eup %322 }
 0x10b   :  { %v265_v38 = vpack.c.bf16 %v209_v35, %v208_v34  ;;  %v207_v39 = vmul.f32 %v323_v36, %v179_v21 }
 0x10d   :  { %267 = vst [vmem:[%s386_s3 + $0x8] sm:$0xff] %v265_v38   ;;  %v260_v40 = vpack.c.bf16 %v207_v39, %v206_v37 }
 0x10f   :  { %261 = vst [vmem:[%s386_s3] sm:$0xff] %v260_v40  }

// kernel: a_call__.10
= control target key start
LH: loop header
LB: loop body
LE: loop exit
PB: predicated region body
PF: predicated region fallthrough
CT: control target
= control target key end

     0   :  { %s714_s1 = inlined_call_operand.vmem [shape: bf16[384,128], index: 1, kind: input, shape index: {}]   ;;  %s715_s0 = inlined_call_operand.vmem [shape: bf16[32,384], index: 0, kind: input, shape index: {}]   ;;  %s716_s2 = inlined_call_operand.vmem [shape: f32[1,128], index: 2, kind: input, shape index: {}]   ;;  %s717_s3 = inlined_call_operand.vmem [shape: bf16[32,128], index: 3, kind: output, shape index: {}]  }
   0x1   :  { %v547_v0 = vld [vmem:[%s714_s1 + $0x78] sm:$0xff]   ;;  %v550_v3 = vld [vmem:[%s714_s1 + $0x70] sm:$0xff]   ;;  %v553_v6 = vld [vmem:[%s714_s1 + $0x68] sm:$0xff]  }
   0x2   :  { %v548_v1 = vld [vmem:[%s714_s1 + $0x38] sm:$0xff]   ;;  %489 = vmatprep.subr.bf16.mxu0 %v547_v0  ;;  %v551_v4 = vld [vmem:[%s714_s1 + $0x30] sm:$0xff]   ;;  %v554_v7 = vld [vmem:[%s714_s1 + $0x28] sm:$0xff]  }
   0x3   :  { %v549_v2 = vld [vmem:[%s714_s1 + $0xb8] sm:$0xff]   ;;  %490 = vmatpush3.bf16.msra.mxu0 %v548_v1  ;;  %v552_v5 = vld [vmem:[%s714_s1 + $0xb0] sm:$0xff]   ;;  %v555_v8 = vld [vmem:[%s714_s1 + $0xa8] sm:$0xff]  }
   0x4   :  { %527 = vmatprep.subr.bf16.mxu1 %v549_v2  ;;  %491 = vmatprep.subr.bf16.mxu0 %v550_v3  ;;  %v556_v9 = vld [vmem:[%s714_s1 + $0x60] sm:$0xff]   ;;  %v559_v12 = vld [vmem:[%s714_s1 + $0x58] sm:$0xff]   ;;  %v562_v15 = vld [vmem:[%s714_s1 + $0x50] sm:$0xff]  }
   0x5   :  { %528 = vmatpush3.bf16.msra.mxu1 %v549_v2  ;;  %v557_v10 = vld [vmem:[%s714_s1 + $0x20] sm:$0xff]   ;;  %v561_v13 = vld [vmem:[%s714_s1 + $0x98] sm:$0xff]   ;;  %v564_v16 = vld [vmem:[%s714_s1 + $0x90] sm:$0xff]  }
   0x6   :  { %529 = vmatprep.subr.bf16.mxu1 %v552_v5  ;;  %v558_v11 = vld [vmem:[%s714_s1 + $0xa0] sm:$0xff]   ;;  %v560_v14 = vld [vmem:[%s714_s1 + $0x18] sm:$0xff]   ;;  %v563_v17 = vld [vmem:[%s714_s1 + $0x10] sm:$0xff]  }
   0x7   :  { %492 = vmatpush3.bf16.msra.mxu0 %v551_v4  ;;  %v565_v18 = vld [vmem:[%s714_s1 + $0x48] sm:$0xff]   ;;  %v568_v21 = vld [vmem:[%s714_s1 + $0x40] sm:$0xff]  }
   0x8   :  { %493 = vmatprep.subr.bf16.mxu0 %v553_v6  ;;  %v566_v19 = vld [vmem:[%s714_s1 + $0x8] sm:$0xff]   ;;  %v570_v22 = vld [vmem:[%s714_s1 + $0x80] sm:$0xff]  }
   0x9   :  { %530 = vmatpush3.bf16.msra.mxu1 %v552_v5  ;;  %v567_v20 = vld [vmem:[%s714_s1 + $0x88] sm:$0xff]   ;;  %v573_v23 = vld [vmem:[%s715_s0 + $0x4] ss:$12 sps:$4 sm:$0xff]   ;;  %v465_v36 = vld [vmem:[%s716_s2] ss:$0 sm:$0xff] }
   0xa   :  { %531 = vmatprep.subr.bf16.mxu1 %v555_v8  ;;  %v574_v24 = vld [vmem:[%s715_s0 + $0x8] ss:$12 sps:$4 sm:$0xff]   ;;  %v569_v25 = vld [vmem:[%s714_s1] sm:$0xff]   ;;  %291 = vmatprep.mubr.bf16.mxu0 %v573_v23 }
   0xb   :  { %494 = vmatpush3.bf16.msra.mxu0 %v554_v7  ;;  %543 = vmatprep.mubr.bf16.mxu1 %v574_v24  ;;  %v571_v26 = vld [vmem:[%s715_s0] ss:$12 sps:$4 sm:$0xff]   ;;  %v576_v27 = vld [vmem:[%s715_s0 + $0x1c] ss:$12 sps:$4 sm:$0xff]   ;;  %v578_v29 = vld [vmem:[%s715_s0 + $0x18] ss:$12 sps:$4 sm:$0xff]  }
   0xc   :  { %495 = vmatprep.subr.bf16.mxu0 %v556_v9  ;;  %v575_v28 = vld [vmem:[%s715_s0 + $0x20] ss:$12 sps:$4 sm:$0xff]  }
   0xd   :  { %532 = vmatpush3.bf16.msra.mxu1 %v555_v8 }
   0xe   :  { %533 = vmatprep.subr.bf16.mxu1 %v558_v11 }
   0xf   :  { %496 = vmatpush3.bf16.msra.mxu0 %v557_v10 }
  0x10   :  { %497 = vmatprep.subr.bf16.mxu0 %v559_v12 }
  0x11   :  { %534 = vmatpush3.bf16.msra.mxu1 %v558_v11 }
  0x12   :  { %535 = vmatprep.subr.bf16.mxu1 %v561_v13 }
  0x13   :  { %498 = vmatpush3.bf16.msra.mxu0 %v560_v14 }
  0x14   :  { %499 = vmatprep.subr.bf16.mxu0 %v562_v15 }
  0x15   :  { %536 = vmatpush3.bf16.msra.mxu1 %v561_v13 }
  0x16   :  { %537 = vmatprep.subr.bf16.mxu1 %v564_v16 }
  0x17   :  { %500 = vmatpush3.bf16.msra.mxu0 %v563_v17 }
  0x18   :  { %501 = vmatprep.subr.bf16.mxu0 %v565_v18 }
  0x19   :  { %538 = vmatpush3.bf16.msra.mxu1 %v564_v16 }
  0x1a   :  { %539 = vmatprep.subr.bf16.mxu1 %v567_v20 }
  0x1b   :  { %502 = vmatpush3.bf16.msra.mxu0 %v566_v19 }
  0x1c   :  { %503 = vmatprep.subr.bf16.mxu0 %v568_v21 }
  0x1d   :  { %540 = vmatpush3.bf16.msra.mxu1 %v567_v20 }
  0x1e   :  { %541 = vmatprep.subr.bf16.mxu1 %v570_v22 }
  0x1f   :  { %504 = vmatpush3.bf16.msra.mxu0 %v569_v25 }
  0x21   :  { %542 = vmatpush3.bf16.msra.mxu1 %v570_v22 }
  0x22   :  { %292 = vmatmul.mubr.bf16.vlgmr.msra.gmra.mxu0 %v571_v26 }
  0x23   :  { %299 = vmatprep.mubr.bf16.mxu0 %v576_v27 }
  0x24   :  { %544 = vmatmul.mubr.bf16.vlgmr.msra.gmra.mxu1 %v575_v28 }
  0x2a   :  { %300 = vmatmul.mubr.bf16.gmra.mxu0 %v578_v29 }
  0xe2   :  { %v505_v30 = vpop.f32.mrf.mxu0 }
  0xe4   :  { %v506_v31 = vpop.f32.mrf.mxu0  ;;  %v545_v32 = vpop.f32.mrf.mxu1 }
  0xe5   :  { %v507_v33 = vadd.f32 %v506_v31, %v505_v30 }
  0xe6   :  { %v508_v34 = vpop.f32.mrf.mxu0  ;;  %v342_v35 = vpop.f32.mrf.mxu1 }
  0xe7   :  { %v343_v37 = vadd.f32 %v507_v33, %v342_v35 }
  0xe8   :  { %v509_v38 = vpop.f32.mrf.mxu0  ;;  %v546_v39 = vpop.f32.mrf.mxu1 }
  0xe9   :  { %v379_v40 = vadd.f32 %v465_v36, %v343_v37  ;;  %v510_v41 = vadd.f32 %v509_v38, %v508_v34 }
  0xea   :  { %v511_v42 = vpop.f32.mrf.mxu0  ;;  %v345_v43 = vpop.f32.mrf.mxu1 }
  0xeb   :  { %v466_v44 = vmul.f32 -1.442695, %v379_v40  ;;  %v346_v45 = vadd.f32 %v510_v41, %v345_v43 }
  0xec   :  { %v512_v46 = vpop.f32.mrf.mxu0 }
  0xed   :  { %579 = vpow2.f32 %v466_v44  ;;  %v380_v47 = vadd.f32 %v465_v36, %v346_v45  ;;  %v513_v48 = vadd.f32 %v512_v46, %v511_v42 }
  0xee   :  { %v514_v49 = vpop.f32.mrf.mxu0 }
  0xef   :  { %v467_v50 = vmul.f32 -1.442695, %v380_v47  ;;  %v351_v51 = vadd.f32 %v545_v32, %v513_v48 }
  0xf0   :  { %v515_v52 = vpop.f32.mrf.mxu0 }
  0xf1   :  { %581 = vpow2.f32 %v467_v50  ;;  %v381_v53 = vadd.f32 %v465_v36, %v351_v51  ;;  %v516_v54 = vadd.f32 %v515_v52, %v514_v49 }
  0xf3   :  { %v468_v55 = vmul.f32 -1.442695, %v381_v53  ;;  %v354_v56 = vadd.f32 %v546_v39, %v516_v54 }
  0xf5   :  { %583 = vpow2.f32 %v468_v55  ;;  %v382_v57 = vadd.f32 %v465_v36, %v354_v56 }
  0xf7   :  { %v469_v58 = vmul.f32 -1.442695, %v382_v57 }
  0xf9   :  { %585 = vpow2.f32 %v469_v58 }
  0xfa   :  { %v580_v59 = vpop.eup %579 }
  0xfb   :  { %v395_v60 = vadd.f32 1.0, %v580_v59 }
  0xfd   :  { %587 = vrcp.f32 %v395_v60 }
  0xfe   :  { %v582_v61 = vpop.eup %581 }
  0xff   :  { %v396_v62 = vadd.f32 1.0, %v582_v61 }
 0x101   :  { %589 = vrcp.f32 %v396_v62 }
 0x102   :  { %v584_v63 = vpop.eup %583 }
 0x103   :  { %v397_v0 = vadd.f32 1.0, %v584_v63 }
 0x105   :  { %591 = vrcp.f32 %v397_v0 }
 0x106   :  { %v586_v1 = vpop.eup %585 }
 0x107   :  { %v398_v2 = vadd.f32 1.0, %v586_v1 }
 0x109   :  { %593 = vrcp.f32 %v398_v2 }
 0x10a   :  { %v588_v3 = vpop.eup %587 }
 0x10b   :  { %v407_v5 = vmul.f32 %v588_v3, %v379_v40 }
 0x10e   :  { %v590_v4 = vpop.eup %589 }
 0x10f   :  { %v408_v6 = vmul.f32 %v590_v4, %v380_v47 }
 0x111   :  { %v481_v7 = vpack.c.bf16 %v408_v6, %v407_v5 }
 0x112   :  { %v592_v8 = vpop.eup %591 }
 0x113   :  { %482 = vst [vmem:[%s717_s3] sm:$0xff] %v481_v7   ;;  %v409_v10 = vmul.f32 %v592_v8, %v381_v53 }
 0x116   :  { %v594_v9 = vpop.eup %593 }
 0x117   :  { %v410_v11 = vmul.f32 %v594_v9, %v382_v57 }
 0x119   :  { %v486_v12 = vpack.c.bf16 %v410_v11, %v409_v10 }
 0x11b   :  { %488 = vst [vmem:[%s717_s3 + $0x8] sm:$0xff] %v486_v12  }

// kernel: a_call__.14
= control target key start
LH: loop header
LB: loop body
LE: loop exit
PB: predicated region body
PF: predicated region fallthrough
CT: control target
= control target key end

     0   :  { %s749_s1 = inlined_call_operand.vmem [shape: bf16[384,128], index: 1, kind: input, shape index: {}]   ;;  %s750_s0 = inlined_call_operand.vmem [shape: bf16[32,384], index: 0, kind: input, shape index: {}]   ;;  %s751_s2 = inlined_call_operand.vmem [shape: f32[1,128], index: 2, kind: input, shape index: {}]   ;;  %s752_s3 = inlined_call_operand.vmem [shape: bf16[32,128], index: 3, kind: input, shape index: {}]   ;;  %s753_s4 = inlined_call_operand.vmem [shape: bf16[32,128], index: 4, kind: output, shape index: {}]  }
   0x1   :  { %v571_v0 = vld [vmem:[%s749_s1 + $0x78] sm:$0xff]   ;;  %v574_v3 = vld [vmem:[%s749_s1 + $0x70] sm:$0xff]   ;;  %v577_v6 = vld [vmem:[%s749_s1 + $0x68] sm:$0xff]  }
   0x2   :  { %v572_v1 = vld [vmem:[%s749_s1 + $0x38] sm:$0xff]   ;;  %513 = vmatprep.subr.bf16.mxu0 %v571_v0  ;;  %v575_v4 = vld [vmem:[%s749_s1 + $0x30] sm:$0xff]   ;;  %v578_v7 = vld [vmem:[%s749_s1 + $0x28] sm:$0xff]  }
   0x3   :  { %v573_v2 = vld [vmem:[%s749_s1 + $0xb8] sm:$0xff]   ;;  %514 = vmatpush3.bf16.msra.mxu0 %v572_v1  ;;  %v576_v5 = vld [vmem:[%s749_s1 + $0xb0] sm:$0xff]   ;;  %v579_v8 = vld [vmem:[%s749_s1 + $0xa8] sm:$0xff]  }
   0x4   :  { %551 = vmatprep.subr.bf16.mxu1 %v573_v2  ;;  %515 = vmatprep.subr.bf16.mxu0 %v574_v3  ;;  %v580_v9 = vld [vmem:[%s749_s1 + $0x60] sm:$0xff]   ;;  %v583_v12 = vld [vmem:[%s749_s1 + $0x58] sm:$0xff]   ;;  %v586_v15 = vld [vmem:[%s749_s1 + $0x50] sm:$0xff]  }
   0x5   :  { %552 = vmatpush3.bf16.msra.mxu1 %v573_v2  ;;  %v581_v10 = vld [vmem:[%s749_s1 + $0x20] sm:$0xff]   ;;  %v585_v13 = vld [vmem:[%s749_s1 + $0x98] sm:$0xff]   ;;  %v588_v16 = vld [vmem:[%s749_s1 + $0x90] sm:$0xff]  }
   0x6   :  { %553 = vmatprep.subr.bf16.mxu1 %v576_v5  ;;  %v582_v11 = vld [vmem:[%s749_s1 + $0xa0] sm:$0xff]   ;;  %v584_v14 = vld [vmem:[%s749_s1 + $0x18] sm:$0xff]   ;;  %v587_v17 = vld [vmem:[%s749_s1 + $0x10] sm:$0xff]  }
   0x7   :  { %516 = vmatpush3.bf16.msra.mxu0 %v575_v4  ;;  %v589_v18 = vld [vmem:[%s749_s1 + $0x48] sm:$0xff]   ;;  %v592_v21 = vld [vmem:[%s749_s1 + $0x40] sm:$0xff]  }
   0x8   :  { %517 = vmatprep.subr.bf16.mxu0 %v577_v6  ;;  %v590_v19 = vld [vmem:[%s749_s1 + $0x8] sm:$0xff]   ;;  %v594_v22 = vld [vmem:[%s749_s1 + $0x80] sm:$0xff]  }
   0x9   :  { %554 = vmatpush3.bf16.msra.mxu1 %v576_v5  ;;  %v591_v20 = vld [vmem:[%s749_s1 + $0x88] sm:$0xff]   ;;  %v597_v23 = vld [vmem:[%s750_s0 + $0x4] ss:$12 sps:$4 sm:$0xff]   ;;  %v480_v36 = vld [vmem:[%s751_s2] ss:$0 sm:$0xff] }
   0xa   :  { %555 = vmatprep.subr.bf16.mxu1 %v579_v8  ;;  %v598_v24 = vld [vmem:[%s750_s0 + $0x8] ss:$12 sps:$4 sm:$0xff]   ;;  %v593_v25 = vld [vmem:[%s749_s1] sm:$0xff]   ;;  %294 = vmatprep.mubr.bf16.mxu0 %v597_v23 }
   0xb   :  { %518 = vmatpush3.bf16.msra.mxu0 %v578_v7  ;;  %567 = vmatprep.mubr.bf16.mxu1 %v598_v24  ;;  %v595_v26 = vld [vmem:[%s750_s0] ss:$12 sps:$4 sm:$0xff]   ;;  %v600_v27 = vld [vmem:[%s750_s0 + $0x1c] ss:$12 sps:$4 sm:$0xff]   ;;  %v602_v29 = vld [vmem:[%s750_s0 + $0x18] ss:$12 sps:$4 sm:$0xff]  }
   0xc   :  { %519 = vmatprep.subr.bf16.mxu0 %v580_v9  ;;  %v599_v28 = vld [vmem:[%s750_s0 + $0x20] ss:$12 sps:$4 sm:$0xff]  }
   0xd   :  { %556 = vmatpush3.bf16.msra.mxu1 %v579_v8  ;;  %v494_v4 = vld [vmem:[%s752_s3] sm:$0xff]  }
   0xe   :  { %557 = vmatprep.subr.bf16.mxu1 %v582_v11  ;;  %v495_v6 = vunpack.c.l.bf16 %v494_v4  ;;  %v496_v7 = vunpack.c.h.bf16 %v494_v4 }
   0xf   :  { %520 = vmatpush3.bf16.msra.mxu0 %v581_v10 }
  0x10   :  { %521 = vmatprep.subr.bf16.mxu0 %v583_v12 }
  0x11   :  { %558 = vmatpush3.bf16.msra.mxu1 %v582_v11 }
  0x12   :  { %559 = vmatprep.subr.bf16.mxu1 %v585_v13 }
  0x13   :  { %522 = vmatpush3.bf16.msra.mxu0 %v584_v14 }
  0x14   :  { %523 = vmatprep.subr.bf16.mxu0 %v586_v15 }
  0x15   :  { %560 = vmatpush3.bf16.msra.mxu1 %v585_v13  ;;  %v511_v13 = vld [vmem:[%s752_s3 + $0x8] sm:$0xff]  }
  0x16   :  { %561 = vmatprep.subr.bf16.mxu1 %v588_v16 }
  0x17   :  { %524 = vmatpush3.bf16.msra.mxu0 %v587_v17  ;;  %v500_v17 = vunpack.c.h.bf16 %v511_v13 }
  0x18   :  { %525 = vmatprep.subr.bf16.mxu0 %v589_v18 }
  0x19   :  { %562 = vmatpush3.bf16.msra.mxu1 %v588_v16  ;;  %v499_v16 = vunpack.c.l.bf16 %v511_v13 }
  0x1a   :  { %563 = vmatprep.subr.bf16.mxu1 %v591_v20 }
  0x1b   :  { %526 = vmatpush3.bf16.msra.mxu0 %v590_v19 }
  0x1c   :  { %527 = vmatprep.subr.bf16.mxu0 %v592_v21 }
  0x1d   :  { %564 = vmatpush3.bf16.msra.mxu1 %v591_v20 }
  0x1e   :  { %565 = vmatprep.subr.bf16.mxu1 %v594_v22 }
  0x1f   :  { %528 = vmatpush3.bf16.msra.mxu0 %v593_v25 }
  0x21   :  { %566 = vmatpush3.bf16.msra.mxu1 %v594_v22 }
  0x22   :  { %295 = vmatmul.mubr.bf16.vlgmr.msra.gmra.mxu0 %v595_v26 }
  0x23   :  { %302 = vmatprep.mubr.bf16.mxu0 %v600_v27 }
  0x24   :  { %568 = vmatmul.mubr.bf16.vlgmr.msra.gmra.mxu1 %v599_v28 }
  0x2a   :  { %303 = vmatmul.mubr.bf16.gmra.mxu0 %v602_v29 }
  0xe2   :  { %v529_v30 = vpop.f32.mrf.mxu0 }
  0xe4   :  { %v530_v31 = vpop.f32.mrf.mxu0  ;;  %v569_v32 = vpop.f32.mrf.mxu1 }
  0xe5   :  { %v531_v33 = vadd.f32 %v530_v31, %v529_v30 }
  0xe6   :  { %v532_v34 = vpop.f32.mrf.mxu0  ;;  %v345_v35 = vpop.f32.mrf.mxu1 }
  0xe7   :  { %v346_v37 = vadd.f32 %v531_v33, %v345_v35 }
  0xe8   :  { %v533_v38 = vpop.f32.mrf.mxu0  ;;  %v570_v39 = vpop.f32.mrf.mxu1 }
  0xe9   :  { %v382_v40 = vadd.f32 %v480_v36, %v346_v37  ;;  %v534_v41 = vadd.f32 %v533_v38, %v532_v34 }
  0xea   :  { %v535_v42 = vpop.f32.mrf.mxu0  ;;  %v348_v43 = vpop.f32.mrf.mxu1 }
  0xeb   :  { %v481_v44 = vmul.f32 -1.442695, %v382_v40  ;;  %v349_v45 = vadd.f32 %v534_v41, %v348_v43 }
  0xec   :  { %v536_v46 = vpop.f32.mrf.mxu0 }
  0xed   :  { %603 = vpow2.f32 %v481_v44  ;;  %v383_v47 = vadd.f32 %v480_v36, %v349_v45  ;;  %v537_v48 = vadd.f32 %v536_v46, %v535_v42 }
  0xee   :  { %v538_v49 = vpop.f32.mrf.mxu0 }
  0xef   :  { %v482_v50 = vmul.f32 -1.442695, %v383_v47  ;;  %v354_v51 = vadd.f32 %v569_v32, %v537_v48 }
  0xf0   :  { %v539_v52 = vpop.f32.mrf.mxu0 }
  0xf1   :  { %605 = vpow2.f32 %v482_v50  ;;  %v384_v53 = vadd.f32 %v480_v36, %v354_v51  ;;  %v540_v54 = vadd.f32 %v539_v52, %v538_v49 }
  0xf3   :  { %v483_v55 = vmul.f32 -1.442695, %v384_v53  ;;  %v357_v56 = vadd.f32 %v570_v39, %v540_v54 }
  0xf5   :  { %607 = vpow2.f32 %v483_v55  ;;  %v385_v57 = vadd.f32 %v480_v36, %v357_v56 }
  0xf7   :  { %v484_v58 = vmul.f32 -1.442695, %v385_v57 }
  0xf9   :  { %609 = vpow2.f32 %v484_v58 }
  0xfa   :  { %v604_v59 = vpop.eup %603 }
  0xfb   :  { %v398_v60 = vadd.f32 1.0, %v604_v59 }
  0xfd   :  { %611 = vrcp.f32 %v398_v60 }
  0xfe   :  { %v606_v61 = vpop.eup %605 }
  0xff   :  { %v399_v62 = vadd.f32 1.0, %v606_v61 }
 0x101   :  { %613 = vrcp.f32 %v399_v62 }
 0x102   :  { %v608_v63 = vpop.eup %607 }
 0x103   :  { %v400_v0 = vadd.f32 1.0, %v608_v63 }
 0x105   :  { %615 = vrcp.f32 %v400_v0 }
 0x106   :  { %v610_v1 = vpop.eup %609 }
 0x107   :  { %v401_v2 = vadd.f32 1.0, %v610_v1 }
 0x109   :  { %617 = vrcp.f32 %v401_v2 }
 0x10a   :  { %v612_v3 = vpop.eup %611 }
 0x10b   :  { %v410_v5 = vmul.f32 %v612_v3, %v382_v40 }
 0x10d   :  { %v422_v10 = vadd.f32 %v495_v6, %v410_v5 }
 0x10e   :  { %v614_v8 = vpop.eup %613 }
 0x10f   :  { %v411_v9 = vmul.f32 %v614_v8, %v383_v47 }
 0x111   :  { %v423_v11 = vadd.f32 %v496_v7, %v411_v9 }
 0x112   :  { %v616_v12 = vpop.eup %615 }
 0x113   :  { %v504_v14 = vpack.c.bf16 %v423_v11, %v422_v10  ;;  %v412_v15 = vmul.f32 %v616_v12, %v384_v53 }
 0x115   :  { %505 = vst [vmem:[%s753_s4] sm:$0xff] %v504_v14   ;;  %v424_v20 = vadd.f32 %v499_v16, %v412_v15 }
 0x116   :  { %v618_v18 = vpop.eup %617 }
 0x117   :  { %v413_v19 = vmul.f32 %v618_v18, %v385_v57 }
 0x119   :  { %v425_v21 = vadd.f32 %v500_v17, %v413_v19 }
 0x11b   :  { %v509_v22 = vpack.c.bf16 %v425_v21, %v424_v20 }
 0x11d   :  { %512 = vst [vmem:[%s753_s4 + $0x8] sm:$0xff] %v509_v22  }

// kernel: a_call__.16
= control target key start
LH: loop header
LB: loop body
LE: loop exit
PB: predicated region body
PF: predicated region fallthrough
CT: control target
= control target key end

     0   :  { %s633_s12 = smov 0   ;;  %s635_s13 = smov 0   ;;  %s682_s0 = inlined_call_operand.vmem [shape: bf16[8,640], index: 0, kind: input, shape index: {}]   ;;  %s683_s1 = inlined_call_operand.vmem [shape: bf16[640,128], index: 1, kind: input, shape index: {}]   ;;  %s684_s2 = inlined_call_operand.vmem [shape: f32[1,128], index: 2, kind: input, shape index: {}]   ;;  %s685_s3 = inlined_call_operand.vmem [shape: bf16[8,128], index: 3, kind: output, shape index: {}]  }
   0x1   :  { %s637_s14 = smov 0  }
   0x2 LB: > { %s25_s15 = sadd.s32 1, %s604_s13  ;;  %p499_p0 = scmp.ge.s32.totalorder %s608_s14, 1  ;;  %s608_s14 = sphi %s637_s14, %s13_s14   ;;  %s604_s13 = sphi %s635_s13, %s687_s13   ;;  %s600_s12 = sphi %s633_s12, %s686_s12  }
   0x3   : > { %p26_p1 = scmp.ge.s32.totalorder %s25_s15, 5  ;;  %p187_p2 = scmp.lt.s32.totalorder %s608_s14, 6 }
   0x5   : > { %s689_s15 = smov (%p26_p1, %s25_s15), 0  ;;  %p188_p3 = pnand %p499_p0, %p187_p2 }
   0x6   : > { %p229_p4 = scmp.lt.s32.totalorder (!%p188_p3), %s600_s12, 4  ;;  %s501_s16 = sshll.u32 (!%p188_p3), %s600_s12, 4 }
   0x7   : > { %191 = sbr.rel (%p188_p3) target bundleno = 295 (0x127), region = 32  ;;  %p236_p5 = scmp.lt.s32.totalorder (!%p188_p3), %s501_s16, 79 }
   0x8   : > { %p503_p6 = scmp.ne.s32.totalorder (!%p188_p3), %s600_s12, 0 }
   0xc   : > { %s230_s17 = scalar_select %p229_p4, %s600_s12, 4 }
   0xd   : > { %s691_s16 = smov (!%p236_p5, %s501_s16), 79  ;;  %258 = sbr.rel (%p503_p6) target bundleno = 20 (0x14), region = 36 }
   0xe   : > { %s500_s18 = sshll.u32 %s230_s17, 2  ;;  %s502_s22 = sshll.u32 %s691_s16, 2 }
   0xf   : > { %s659_s21 = scalar_lea.vmem %s682_s0, %s500_s18  ;;  %s242_s25 = scalar_lea.vmem %s683_s1, %s502_s22 }
  0x12   : > { %v610_v0 = vmov 0.0  }
  0x13   : > { %259 = vst [vmem:[#allocation2] sm:$0xff] %v610_v0 }
  0x14 PF: > { %v574_v1 = vld [vmem:[%s242_s25 + $0x38] sm:$0xff]   ;;  %v611_v2 = vmov 0.0   ;;  %v575_v3 = vld [vmem:[%s242_s25 + $0x30] sm:$0xff]   ;;  %vm612_vm0 = vmmov 0   ;;  %v576_v4 = vld [vmem:[%s242_s25 + $0x28] sm:$0xff]   ;;  %p512_p7 = scmp.ne.s32.totalorder %s600_s12, 4 }
  0x15   : > { %527 = vmatprep.subr.bf16.mxu0 %v611_v2  ;;  %543 = vmatprep.mubr.msk.bf16.mxu0 %vm612_vm0, %v611_v2  ;;  %v577_v5 = vld [vmem:[%s242_s25 + $0x20] sm:$0xff]   ;;  %v578_v6 = vld [vmem:[%s242_s25 + $0x18] sm:$0xff]   ;;  %v579_v7 = vld [vmem:[%s242_s25 + $0x10] sm:$0xff]  }
  0x16   : > { %528 = vmatpush3.bf16.msra.mxu0 %v574_v1  ;;  %v580_v8 = vld [vmem:[%s242_s25 + $0x8] sm:$0xff]   ;;  %v581_v9 = vld [vmem:[%s242_s25] sm:$0xff]  }
  0x17   : > { %529 = vmatprep.subr.bf16.mxu0 %v611_v2  ;;  %v261_v10 = vld [vmem:[%s659_s21] sm:$0xf] }
  0x1a   : > { %530 = vmatpush3.bf16.msra.mxu0 %v575_v3  ;;  %v260_v11 = vld [vmem:[#allocation2] sm:$0xff] }
  0x1b   : > { %531 = vmatprep.subr.bf16.mxu0 %v611_v2 }
  0x1e   : > { %532 = vmatpush3.bf16.msra.mxu0 %v576_v4 }
  0x1f   : > { %533 = vmatprep.subr.bf16.mxu0 %v611_v2 }
  0x22   : > { %534 = vmatpush3.bf16.msra.mxu0 %v577_v5 }
  0x23   : > { %535 = vmatprep.subr.bf16.mxu0 %v611_v2 }
  0x26   : > { %536 = vmatpush3.bf16.msra.mxu0 %v578_v6 }
  0x27   : > { %537 = vmatprep.subr.bf16.mxu0 %v611_v2 }
  0x2a   : > { %538 = vmatpush3.bf16.msra.mxu0 %v579_v7 }
  0x2b   : > { %539 = vmatprep.subr.bf16.mxu0 %v611_v2 }
  0x2e   : > { %540 = vmatpush3.bf16.msra.mxu0 %v580_v8 }
  0x2f   : > { %541 = vmatprep.subr.bf16.mxu0 %v611_v2 }
  0x32   : > { %542 = vmatpush3.bf16.msra.mxu0 %v581_v9 }
  0x35   : > { %544 = vmatmul.mubr.bf16.vlgmr.msra.gmra.mxu0 %v261_v10 }
  0xf5   : > { %v360_v12 = vpop.f32.mrf.mxu0 }
  0xf6   : > { %v366_v13 = vadd.f32 %v360_v12, %v260_v11 }
  0xf7   : > { %v545_v14 = vpop.f32.mrf.mxu0  ;;  %371 = sbr.rel (%p512_p7) target bundleno = 295 (0x127), region = 40 }
  0xf8   : > { %367 = vst [vmem:[#allocation2] sm:$0xff] %v366_v13 }
  0xf9   : > { %v363_v15 = vpop.f32.mrf.mxu0 }
  0xfb   : > { %v546_v16 = vpop.f32.mrf.mxu0 }
  0xfc   : > { %v513_v18 = vld [vmem:[%s684_s2] ss:$0 sm:$0xff] }
  0xff   : > { %v372_v17 = vld [vmem:[#allocation2] sm:$0xff] }
 0x100   : > { %v380_v19 = vadd.f32 %v513_v18, %v372_v17 }
 0x102   : > { %v514_v20 = vmul.f32 -1.442695, %v380_v19 }
 0x104   : > { %582 = vpow2.f32 %v514_v20 }
 0x111   : > { %v583_v21 = vpop.eup %582 }
 0x112   : > { %v384_v22 = vadd.f32 1.0, %v583_v21 }
 0x114   : > { %584 = vrcp.f32 %v384_v22 }
 0x121   : > { %v585_v23 = vpop.eup %584 }
 0x122   : > { %v387_v24 = vmul.f32 %v585_v23, %v380_v19 }
 0x124   : > { %v388_v25 = vpack.c.bf16 %v387_v24, %v387_v24 }
 0x126   : > { %389 = vst [vmem:[%s685_s3] sm:$0xf] %v388_v25 }
 0x127 PF: > { %s13_s14 = sadd.s32 1, %s608_s14   ;;  %s686_s12 = smov %s604_s13 }
 0x128   : > { %p10_p8 = scmp.ge.s32.totalorder %s13_s14, 7   ;;  %s687_s13 = smov %s689_s15 }
 0x12a   :  { %12 = sbr.rel (!%p10_p8) target bundleno = 2 (0x2), region = 76 }

// kernel: a_call__.17
= control target key start
LH: loop header
LB: loop body
LE: loop exit
PB: predicated region body
PF: predicated region fallthrough
CT: control target
= control target key end

     0   :  { %v193_v0 = vmov 0.0   ;;  %vm194_vm0 = vmmov 0   ;;  %s248_s1 = inlined_call_operand.vmem [shape: bf16[128,128], index: 1, kind: input, shape index: {}]   ;;  %s249_s0 = inlined_call_operand.vmem [shape: bf16[8,128], index: 0, kind: input, shape index: {}]   ;;  %s250_s2 = inlined_call_operand.vmem [shape: f32[1,128], index: 2, kind: input, shape index: {}]   ;;  %s251_s3 = inlined_call_operand.vmem [shape: f32[8,128], index: 3, kind: output, shape index: {}]  }
   0x1   :  { %163 = vmatprep.subr.bf16.mxu0 %v193_v0  ;;  %v185_v1 = vld [vmem:[%s248_s1 + $0x38] sm:$0xff]   ;;  %179 = vmatprep.mubr.msk.bf16.mxu0 %vm194_vm0, %v193_v0  ;;  %v186_v2 = vld [vmem:[%s248_s1 + $0x30] sm:$0xff]   ;;  %v187_v3 = vld [vmem:[%s248_s1 + $0x28] sm:$0xff]  }
   0x2   :  { %164 = vmatpush3.bf16.msra.mxu0 %v185_v1  ;;  %v188_v4 = vld [vmem:[%s248_s1 + $0x20] sm:$0xff]   ;;  %v189_v5 = vld [vmem:[%s248_s1 + $0x18] sm:$0xff]   ;;  %v190_v6 = vld [vmem:[%s248_s1 + $0x10] sm:$0xff]  }
   0x3   :  { %165 = vmatprep.subr.bf16.mxu0 %v193_v0  ;;  %v191_v7 = vld [vmem:[%s248_s1 + $0x8] sm:$0xff]   ;;  %v192_v8 = vld [vmem:[%s248_s1] sm:$0xff]  }
   0x4   :  { %v21_v9 = vld [vmem:[%s249_s0] sm:$0xf] }
   0x5   :  { %v153_v10 = vld [vmem:[%s250_s2] ss:$0 sm:$0xff] }
   0x6   :  { %166 = vmatpush3.bf16.msra.mxu0 %v186_v2 }
   0x7   :  { %167 = vmatprep.subr.bf16.mxu0 %v193_v0 }
   0xa   :  { %168 = vmatpush3.bf16.msra.mxu0 %v187_v3 }
   0xb   :  { %169 = vmatprep.subr.bf16.mxu0 %v193_v0 }
   0xe   :  { %170 = vmatpush3.bf16.msra.mxu0 %v188_v4 }
   0xf   :  { %171 = vmatprep.subr.bf16.mxu0 %v193_v0 }
  0x12   :  { %172 = vmatpush3.bf16.msra.mxu0 %v189_v5 }
  0x13   :  { %173 = vmatprep.subr.bf16.mxu0 %v193_v0 }
  0x16   :  { %174 = vmatpush3.bf16.msra.mxu0 %v190_v6 }
  0x17   :  { %175 = vmatprep.subr.bf16.mxu0 %v193_v0 }
  0x1a   :  { %176 = vmatpush3.bf16.msra.mxu0 %v191_v7 }
  0x1b   :  { %177 = vmatprep.subr.bf16.mxu0 %v193_v0 }
  0x1e   :  { %178 = vmatpush3.bf16.msra.mxu0 %v192_v8 }
  0x21   :  { %180 = vmatmul.mubr.bf16.vlgmr.msra.gmra.mxu0 %v21_v9 }
  0xe1   :  { %v120_v11 = vpop.f32.mrf.mxu0 }
  0xe2   :  { %v139_v12 = vadd.f32 %v153_v10, %v120_v11 }
  0xe3   :  { %v181_v13 = vpop.f32.mrf.mxu0 }
  0xe4   :  { %140 = vst [vmem:[%s251_s3] sm:$0xff] %v139_v12 }
  0xe5   :  { %v123_v14 = vpop.f32.mrf.mxu0 }
  0xe7   :  { %v182_v15 = vpop.f32.mrf.mxu0 }

</bundles_post_ra>
